<compile_context>
chip_gen: v7x
topology: tpu7x:2x2x1
jax: 0.10.0
libtpu: 0.0.40
codegen_flags: <defaults>
</compile_context>

<pallas_src>
import jax
import jax.numpy as jnp
from jax.experimental import pallas as pl
from jax.experimental.pallas import tpu as pltpu

INPUT_SIZE = 784
HIDDEN = 256
NUM_CLASSES = 10
OUT_PAD = 128          # 10 padded up to 128: lane-dense output stores (no vst.msk)
TM_MAX = 2048          # batch tile cap; multiple of 256 (v6e/v7x MXU) and 128 (v5e MXU)
VMEM_LIMIT = 48 * 1024 * 1024   # fits TM=2048 double-buffered f32 x + temps on v5e/v6e/v7x


def _round_up(x, m):
    return (x + m - 1) // m * m


def _choose_tm(n, tm_max):
    """Batch tile: multiple of 128, capped at tm_max, and split so large batches
    produce >= 2 grid steps (so v7x's 2 TensorCores both get work)."""
    tm = min(tm_max, _round_up(n, 128))
    if n >= 512:
        tm = min(tm, _round_up(-(-n // 2), 128))
    return max(tm, 128)


def mlp_kernel(x_ref, w1_ref, b1_ref, w2_ref, b2_ref, w3_ref, b3_ref, o_ref):
    # x: f32 [TM, 784]; w1: bf16 [784, 256]; w2: bf16 [256, 256]; w3: bf16 [256, 128]
    # b1/b2: f32 [1, 256]; b3: f32 [1, 128]; o: bf16 [TM, 128]
    x = x_ref[...].astype(jnp.bfloat16)

    # fc1 + ReLU (dropout = identity in eval mode); bias/ReLU in f32, cast to bf16 for MXU.
    h1 = jnp.dot(x, w1_ref[...], preferred_element_type=jnp.float32) + b1_ref[...]
    h1 = jnp.maximum(h1, 0.0).astype(jnp.bfloat16)

    # fc2 + ReLU
    h2 = jnp.dot(h1, w2_ref[...], preferred_element_type=jnp.float32) + b2_ref[...]
    h2 = jnp.maximum(h2, 0.0).astype(jnp.bfloat16)

    # fc3 (logits, lane-padded to 128), stored as bf16
    out = jnp.dot(h2, w3_ref[...], preferred_element_type=jnp.float32) + b3_ref[...]
    o_ref[...] = out.astype(o_ref.dtype)


def prepare_params(params):
    """One-time weight prep: (in, out) layout, bf16 weights, lane-padded last layer.

    Call once at init; the result is what simple_model_forward consumes."""
    w1, b1, w2, b2, w3, b3 = params
    w1_p = w1.astype(jnp.bfloat16)                                  # (784, 256)
    w2_p = w2.astype(jnp.bfloat16)                                  # (256, 256)
    w3_p = jnp.zeros((HIDDEN, OUT_PAD), jnp.bfloat16).at[:, :NUM_CLASSES].set(
        w3.astype(jnp.bfloat16))                                    # (256, 128)
    b1_p = b1.reshape(1, HIDDEN).astype(jnp.float32)
    b2_p = b2.reshape(1, HIDDEN).astype(jnp.float32)
    b3_p = jnp.zeros((1, OUT_PAD), jnp.float32).at[:, :NUM_CLASSES].set(
        b3.reshape(1, NUM_CLASSES).astype(jnp.float32))
    return (w1_p, b1_p, w2_p, b2_p, w3_p, b3_p)


def simple_model_forward(x, prepared_params, tm_max=TM_MAX):
    """x: [N, ...] float32 with prod(...) == 784. Returns logits [N, 10] float32."""
    w1_p, b1_p, w2_p, b2_p, w3_p, b3_p = prepared_params
    n = x.shape[0]
    x_flat = x.reshape(n, -1)          # x.view(x.size(0), -1); free reshape, stays f32
    assert x_flat.shape[1] == INPUT_SIZE

    tm = _choose_tm(n, tm_max)
    grid = (pl.cdiv(n, tm),)
    resident = lambda shape: pl.BlockSpec(shape, lambda i: (0, 0))  # VMEM-resident across steps

    out_padded = pl.pallas_call(
        mlp_kernel,
        out_shape=jax.ShapeDtypeStruct((n, OUT_PAD), jnp.bfloat16),
        grid=grid,
        in_specs=[
            pl.BlockSpec((tm, INPUT_SIZE), lambda i: (i, 0)),  # x: pipelined over batch tiles
            resident((INPUT_SIZE, HIDDEN)),                    # w1 (bf16)
            resident((1, HIDDEN)),                             # b1 (f32)
            resident((HIDDEN, HIDDEN)),                        # w2 (bf16)
            resident((1, HIDDEN)),                             # b2 (f32)
            resident((HIDDEN, OUT_PAD)),                       # w3 (bf16, lane-padded)
            resident((1, OUT_PAD)),                            # b3 (f32, lane-padded)
        ],
        out_specs=pl.BlockSpec((tm, OUT_PAD), lambda i: (i, 0)),
        compiler_params=pltpu.CompilerParams(
            dimension_semantics=("parallel",),   # shard batch tiles across TCs on v7x
            vmem_limit_bytes=VMEM_LIMIT,
        ),
    )(x_flat, w1_p, b1_p, w2_p, b2_p, w3_p, b3_p)

    return out_padded[:n, :NUM_CLASSES].astype(jnp.float32)


def init_params(key, input_size=784, hidden_size=256, num_classes=10):
    """Deterministic init mimicking nn.Linear default (uniform +/- 1/sqrt(fan_in)).

    Weights are stored as (in_features, out_features)."""
    ks = jax.random.split(key, 6)

    def linear(kw, kb, fan_in, fan_out):
        bound = 1.0 / jnp.sqrt(fan_in)
        w = jax.random.uniform(kw, (fan_in, fan_out), jnp.float32, -bound, bound)
        b = jax.random.uniform(kb, (1, fan_out), jnp.float32, -bound, bound)
        return w, b

    w1, b1 = linear(ks[0], ks[1], input_size, hidden_size)
    w2, b2 = linear(ks[2], ks[3], hidden_size, hidden_size)
    w3, b3 = linear(ks[4], ks[5], hidden_size, num_classes)
    return (w1, b1, w2, b2, w3, b3)


def _reference_forward(x, params):
    """Plain-JAX f32 reference of the same forward pass (eval-mode dropout)."""
    w1, b1, w2, b2, w3, b3 = params
    xf = x.reshape(x.shape[0], -1)
    h = jnp.maximum(xf @ w1 + b1, 0.0)
    h = jnp.maximum(h @ w2 + b2, 0.0)
    return h @ w3 + b3


if __name__ == "__main__":
    key = jax.random.PRNGKey(0)
    k_x, k_p, k_x2 = jax.random.split(key, 3)
    params = init_params(k_p)
    prepped = prepare_params(params)          # one-time weight prep (hoisted out of forward)

    # Small example input: batch=8, NCHW [8, 1, 28, 28] -> flattens to 784 features.
    x = jax.random.normal(k_x, (8, 1, 28, 28), dtype=jnp.float32)
    logits = simple_model_forward(x, prepped)
    jax.block_until_ready(logits)

    ref = _reference_forward(x, params)
    assert logits.shape == (8, 10)
    assert jnp.allclose(logits, ref, atol=5e-2, rtol=5e-2), \
        f"max abs err {jnp.max(jnp.abs(logits - ref))}"

    # Second check: batch not a tile multiple with a small tm cap -> multi-step grid
    # (tm=128, 2 steps) plus a masked partial tail tile, exercising the pipelined path.
    x2 = jax.random.normal(k_x2, (130, 1, 28, 28), dtype=jnp.float32)
    logits2 = simple_model_forward(x2, prepped, tm_max=128)
    jax.block_until_ready(logits2)
    ref2 = _reference_forward(x2, params)
    assert logits2.shape == (130, 10)
    assert jnp.allclose(logits2, ref2, atol=5e-2, rtol=5e-2), \
        f"max abs err {jnp.max(jnp.abs(logits2 - ref2))}"

    print("KERNEL_OK")
</pallas_src>

<mosaic_0001>
module attributes {stable_mosaic.version = 11 : i64} {
  func.func @mlp_kernel(%arg0: i32, %arg1: memref<128x784xf32, #tpu.memory_space<vmem>>, %arg2: memref<784x256xbf16, #tpu.memory_space<vmem>>, %arg3: memref<1x256xf32, #tpu.memory_space<vmem>>, %arg4: memref<256x256xbf16, #tpu.memory_space<vmem>>, %arg5: memref<1x256xf32, #tpu.memory_space<vmem>>, %arg6: memref<256x128xbf16, #tpu.memory_space<vmem>>, %arg7: memref<1x128xf32, #tpu.memory_space<vmem>>, %arg8: memref<128x128xbf16, #tpu.memory_space<vmem>>) attributes {dimension_semantics = [#tpu.dimension_semantics<parallel>], iteration_bounds = array<i64: 1>, scalar_prefetch = 0 : i64, scratch_operands = 0 : i64, tpu.core_type = #tpu.core_type<tc>, window_params = [{transform_indices = @transform_0, window_bounds = array<i64: 128, 784>}, {pipeline_mode = #tpu.pipeline_mode<synchronous>, transform_indices = @transform_1, window_bounds = array<i64: 784, 256>}, {pipeline_mode = #tpu.pipeline_mode<synchronous>, transform_indices = @transform_2, window_bounds = array<i64: 1, 256>}, {pipeline_mode = #tpu.pipeline_mode<synchronous>, transform_indices = @transform_3, window_bounds = array<i64: 256, 256>}, {pipeline_mode = #tpu.pipeline_mode<synchronous>, transform_indices = @transform_4, window_bounds = array<i64: 1, 256>}, {pipeline_mode = #tpu.pipeline_mode<synchronous>, transform_indices = @transform_5, window_bounds = array<i64: 256, 128>}, {pipeline_mode = #tpu.pipeline_mode<synchronous>, transform_indices = @transform_6, window_bounds = array<i64: 1, 128>}, {transform_indices = @transform_7, window_bounds = array<i64: 128, 128>}]} {
    %c0 = arith.constant 0 : index
    %c0_0 = arith.constant 0 : index
    %0 = vector.load %arg1[%c0, %c0_0] : memref<128x784xf32, #tpu.memory_space<vmem>>, vector<128x784xf32>
    %1 = arith.truncf %0 : vector<128x784xf32> to vector<128x784xbf16>
    %c0_1 = arith.constant 0 : index
    %c0_2 = arith.constant 0 : index
    %2 = vector.load %arg2[%c0_1, %c0_2] : memref<784x256xbf16, #tpu.memory_space<vmem>>, vector<784x256xbf16>
    %cst = arith.constant dense<0.000000e+00> : vector<128x256xf32>
    %3 = tpu.matmul %1, %2, %cst {dimension_numbers = #tpu.dot_dimension_numbers<[1], [0], [0], [1], [0, 0, 1, 1], [], []>} : vector<128x784xbf16>, vector<784x256xbf16>, vector<128x256xf32> -> vector<128x256xf32>
    %c0_3 = arith.constant 0 : index
    %c0_4 = arith.constant 0 : index
    %4 = vector.load %arg3[%c0_3, %c0_4] : memref<1x256xf32, #tpu.memory_space<vmem>>, vector<1x256xf32>
    %5 = vector.broadcast %4 : vector<1x256xf32> to vector<128x256xf32>
    %6 = arith.addf %3, %5 : vector<128x256xf32>
    %cst_5 = arith.constant 0.000000e+00 : f32
    %7 = vector.broadcast %cst_5 : f32 to vector<128x256xf32>
    %8 = arith.maximumf %6, %7 : vector<128x256xf32>
    %9 = arith.truncf %8 : vector<128x256xf32> to vector<128x256xbf16>
    %c0_6 = arith.constant 0 : index
    %c0_7 = arith.constant 0 : index
    %10 = vector.load %arg4[%c0_6, %c0_7] : memref<256x256xbf16, #tpu.memory_space<vmem>>, vector<256x256xbf16>
    %cst_8 = arith.constant dense<0.000000e+00> : vector<128x256xf32>
    %11 = tpu.matmul %9, %10, %cst_8 {dimension_numbers = #tpu.dot_dimension_numbers<[1], [0], [0], [1], [0, 0, 1, 1], [], []>} : vector<128x256xbf16>, vector<256x256xbf16>, vector<128x256xf32> -> vector<128x256xf32>
    %c0_9 = arith.constant 0 : index
    %c0_10 = arith.constant 0 : index
    %12 = vector.load %arg5[%c0_9, %c0_10] : memref<1x256xf32, #tpu.memory_space<vmem>>, vector<1x256xf32>
    %13 = vector.broadcast %12 : vector<1x256xf32> to vector<128x256xf32>
    %14 = arith.addf %11, %13 : vector<128x256xf32>
    %cst_11 = arith.constant 0.000000e+00 : f32
    %15 = vector.broadcast %cst_11 : f32 to vector<128x256xf32>
    %16 = arith.maximumf %14, %15 : vector<128x256xf32>
    %17 = arith.truncf %16 : vector<128x256xf32> to vector<128x256xbf16>
    %c0_12 = arith.constant 0 : index
    %c0_13 = arith.constant 0 : index
    %18 = vector.load %arg6[%c0_12, %c0_13] : memref<256x128xbf16, #tpu.memory_space<vmem>>, vector<256x128xbf16>
    %cst_14 = arith.constant dense<0.000000e+00> : vector<128x128xf32>
    %19 = tpu.matmul %17, %18, %cst_14 {dimension_numbers = #tpu.dot_dimension_numbers<[1], [0], [0], [1], [0, 0, 1, 1], [], []>} : vector<128x256xbf16>, vector<256x128xbf16>, vector<128x128xf32> -> vector<128x128xf32>
    %c0_15 = arith.constant 0 : index
    %c0_16 = arith.constant 0 : index
    %20 = vector.load %arg7[%c0_15, %c0_16] : memref<1x128xf32, #tpu.memory_space<vmem>>, vector<1x128xf32>
    %21 = vector.broadcast %20 : vector<1x128xf32> to vector<128x128xf32>
    %22 = arith.addf %19, %21 : vector<128x128xf32>
    %23 = arith.truncf %22 : vector<128x128xf32> to vector<128x128xbf16>
    %c0_17 = arith.constant 0 : index
    %c0_18 = arith.constant 0 : index
    %24 = vector.load %arg8[%c0_17, %c0_18] : memref<128x128xbf16, #tpu.memory_space<vmem>>, vector<128x128xbf16>
    tpu.vector_store %arg8[%c0_17, %c0_18], %23 {strides = array<i32>} : memref<128x128xbf16, #tpu.memory_space<vmem>>, vector<128x128xbf16>,
    return
  }
  func.func @transform_0(%arg0: i32) -> (i32, i32) {
    %c0_i32 = arith.constant 0 : i32
    %c0_i32_0 = arith.constant 0 : i32
    return %arg0, %c0_i32 : i32, i32
  }
  func.func @transform_1(%arg0: i32) -> (i32, i32) {
    %c0_i32 = arith.constant 0 : i32
    %c0_i32_0 = arith.constant 0 : i32
    %c0_i32_1 = arith.constant 0 : i32
    return %c0_i32, %c0_i32_0 : i32, i32
  }
  func.func @transform_2(%arg0: i32) -> (i32, i32) {
    %c0_i32 = arith.constant 0 : i32
    %c0_i32_0 = arith.constant 0 : i32
    %c0_i32_1 = arith.constant 0 : i32
    return %c0_i32, %c0_i32_0 : i32, i32
  }
  func.func @transform_3(%arg0: i32) -> (i32, i32) {
    %c0_i32 = arith.constant 0 : i32
    %c0_i32_0 = arith.constant 0 : i32
    %c0_i32_1 = arith.constant 0 : i32
    return %c0_i32, %c0_i32_0 : i32, i32
  }
  func.func @transform_4(%arg0: i32) -> (i32, i32) {
    %c0_i32 = arith.constant 0 : i32
    %c0_i32_0 = arith.constant 0 : i32
    %c0_i32_1 = arith.constant 0 : i32
    return %c0_i32, %c0_i32_0 : i32, i32
  }
  func.func @transform_5(%arg0: i32) -> (i32, i32) {
    %c0_i32 = arith.constant 0 : i32
    %c0_i32_0 = arith.constant 0 : i32
    %c0_i32_1 = arith.constant 0 : i32
    return %c0_i32, %c0_i32_0 : i32, i32
  }
  func.func @transform_6(%arg0: i32) -> (i32, i32) {
    %c0_i32 = arith.constant 0 : i32
    %c0_i32_0 = arith.constant 0 : i32
    %c0_i32_1 = arith.constant 0 : i32
    return %c0_i32, %c0_i32_0 : i32, i32
  }
  func.func @transform_7(%arg0: i32) -> (i32, i32) {
    %c0_i32 = arith.constant 0 : i32
    %c0_i32_0 = arith.constant 0 : i32
    return %arg0, %c0_i32 : i32, i32
  }
}

</mosaic_0001>

<bundles_post_ra>
// kernel: tpu_custom_call.1
= control target key start
LH: loop header
LB: loop body
LE: loop exit
PB: predicated region body
PF: predicated region fallthrough
CT: control target
= control target key end

     0   :  { %12 = vsyncpa [#allocation3], 0  ;;  %s3161_s0 = inlined_call_operand.hbm [shape: f32[8,784], index: 0, kind: input, shape index: {}]   ;;  %s3162_s1 = inlined_call_operand.hbm [shape: bf16[784,256], index: 1, kind: input, shape index: {}]   ;;  %s3163_s2 = inlined_call_operand.vmem [shape: f32[1,256], index: 2, kind: input, shape index: {}]   ;;  %s3164_s3 = inlined_call_operand.hbm [shape: bf16[256,256], index: 3, kind: input, shape index: {}]   ;;  %s3165_s4 = inlined_call_operand.vmem [shape: f32[1,256], index: 4, kind: input, shape index: {}]   ;;  %s3166_s5 = inlined_call_operand.hbm [shape: bf16[256,128], index: 5, kind: input, shape index: {}]   ;;  %s3167_s6 = inlined_call_operand.vmem [shape: f32[1,128], index: 6, kind: input, shape index: {}]   ;;  %s3168_s7 = inlined_call_operand.hbm [shape: bf16[8,128], index: 7, kind: output, shape index: {}]  }
   0x1   :  { %13 = vsyncpa [#allocation6], 0 }
   0x2   :  { %14 = vsyncpa [#allocation9], 0 }
   0x3   :  { %15 = vsyncpa [#allocation4], 0 }
   0x4   :  { %20 = vsyncadd [#allocation3], 13440  ;;  %s2839_s24 = smov [#allocation5]   ;;  %s2721_s28 = scalar_lea.hbm %s3162_s1, 12544 }
   0x5   :  { %s33_s25 = sshll.u32 %s2839_s24, 4  ;;  %p2722_p0 = scmp.ne.s32.totalorder %s3162_s1, %s2721_s28  ;;  %s34_s25 = int_to_ptr.vmem [resolvable:$true] %s33_s25 }
   0x6   :  { %p2725_p1 = scmp.lt.u32.totalorder %s2721_s28, %s3162_s1 }
   0x8   :  { %p2727_p2 = pnand %p2725_p1, %p2722_p0 }
   0xa   :  { %2730 = shalt.err (!%p2727_p2)
}
   0xb   :  { %s2731_s10 = scalar_lea.vmem %s34_s25, 12544  ;;  %p2736_p4 = scmp.lt.s32.totalorder %s34_s25, %s34_s25 }
   0xc   :  { %p2732_p3 = scmp.ne.s32.totalorder %s34_s25, %s2731_s10  ;;  %p2737_p5 = scmp.lt.s32.totalorder %s2731_s10, %s2731_s10 }
   0xe   :  { %p2738_p6 = por %p2737_p5, %p2736_p4 }
  0x10   :  { %p2739_p7 = pnand %p2738_p6, %p2732_p3 }
  0x12   :  { %2742 = shalt.err (!%p2739_p7)
}
  0x13   :  { %s2840_s11 = smov 128   ;;  %s2841_s12 = smov 8  }
  0x14   :  { %39 = dma.hbm_to_vmem [thread:$0]  %s3162_s1, 12544, %s34_s25, [#allocation6], %s2840_s11, %s2840_s11, %s2841_s12  }
  0x15   :  { %s2842_s15 = smov [#allocation2]   ;;  %s2743_s19 = scalar_lea.hbm %s3161_s0, 896 }
  0x16   :  { %s21_s16 = sshll.u32 %s2842_s15, 4  ;;  %p2744_p8 = scmp.ne.s32.totalorder %s3161_s0, %s2743_s19  ;;  %s22_s16 = int_to_ptr.vmem [resolvable:$true] %s21_s16 }
  0x17   :  { %p2747_p9 = scmp.lt.u32.totalorder %s2743_s19, %s3161_s0 }
  0x19   :  { %p2749_p10 = pnand %p2747_p9, %p2744_p8 }
  0x1b   :  { %2752 = shalt.err (!%p2749_p10)
}
  0x1c   :  { %s2753_s24 = scalar_lea.vmem %s22_s16, 896  ;;  %s2757_s1 = scalar_lea.vmem %s22_s16, 14336 }
  0x1d   :  { %p2754_p11 = scmp.ne.s32.totalorder %s22_s16, %s2753_s24  ;;  %p2758_p12 = scmp.lt.s32.totalorder %s22_s16, %s22_s16 }
  0x1e   :  { %p2759_p13 = scmp.lt.s32.totalorder %s2757_s1, %s2753_s24 }
  0x20   :  { %p2760_p0 = por %p2759_p13, %p2758_p12 }
  0x22   :  { %p2761_p1 = pnand %p2760_p0, %p2754_p11 }
  0x24   :  { %2764 = shalt.err (!%p2761_p1)
}
  0x25   :  { %s2843_s25 = smov 896   ;;  %s2844_s26 = smov 56  }
  0x26   :  { %27 = dma.hbm_to_vmem [thread:$0]  %s3161_s0, 896, %s22_s16, [#allocation3], %s2843_s25, %s2843_s25, %s2844_s26  }
  0x27   :  { %s2845_s29 = smov [#allocation7]   ;;  %s2846_s8 = smov [#allocation8]  }
  0x28   :  { %s47_s30 = sshll.u32 %s2845_s29, 4  ;;  %s61_s9 = sshll.u32 %s2846_s8, 4  ;;  %s48_s30 = int_to_ptr.vmem [resolvable:$true] %s47_s30  ;;  %s2918_s9 = int_to_ptr.vmem [resolvable:$true] %s61_s9 }
  0x29   :  { %s2765_s14 = scalar_lea.hbm %s3164_s3, 4096 }
  0x2a   :  { %p2766_p2 = scmp.ne.s32.totalorder %s3164_s3, %s2765_s14  ;;  %p2769_p3 = scmp.lt.u32.totalorder %s2765_s14, %s3164_s3 }
  0x2c   :  { %p2771_p4 = pnand %p2769_p3, %p2766_p2 }
  0x2e   :  { %2774 = shalt.err (!%p2771_p4)
}
  0x2f   :  { %s2775_s0 = scalar_lea.vmem %s48_s30, 4096  ;;  %p2780_p6 = scmp.lt.s32.totalorder %s48_s30, %s48_s30 }
  0x30   :  { %p2776_p5 = scmp.ne.s32.totalorder %s48_s30, %s2775_s0  ;;  %p2781_p7 = scmp.lt.s32.totalorder %s2775_s0, %s2775_s0 }
  0x32   :  { %p2782_p8 = por %p2781_p7, %p2780_p6 }
  0x34   :  { %p2783_p9 = pnand %p2782_p8, %p2776_p5 }
  0x36   :  { %2786 = shalt.err (!%p2783_p9)
}
  0x37   :  { %53 = dma.hbm_to_vmem [thread:$0]  %s3164_s3, 4096, %s48_s30, [#allocation6], %s2840_s11, %s2840_s11, %s2841_s12  }
  0x38   :  { %s2787_s23 = scalar_lea.hbm %s3166_s5, 2048 }
  0x39   :  { %p2788_p10 = scmp.ne.s32.totalorder %s3166_s5, %s2787_s23  ;;  %p2791_p11 = scmp.lt.u32.totalorder %s2787_s23, %s3166_s5 }
  0x3b   :  { %p2793_p12 = pnand %p2791_p11, %p2788_p10 }
  0x3d   :  { %2796 = shalt.err (!%p2793_p12)
}
  0x3e   :  { %s2797_s27 = scalar_lea.vmem %s2918_s9, 2048  ;;  %p2802_p0 = scmp.lt.s32.totalorder %s2918_s9, %s2918_s9 }
  0x3f   :  { %p2798_p13 = scmp.ne.s32.totalorder %s2918_s9, %s2797_s27  ;;  %p2803_p1 = scmp.lt.s32.totalorder %s2797_s27, %s2797_s27 }
  0x41   :  { %p2804_p2 = por %p2803_p1, %p2802_p0 }
  0x43   :  { %p2805_p3 = pnand %p2804_p2, %p2798_p13 }
  0x45   :  { %2808 = shalt.err (!%p2805_p3)
}
  0x46   :  { %s2847_s3 = smov 64   ;;  %s2848_s11 = smov 4  }
  0x47   :  { %67 = dma.hbm_to_vmem [thread:$0]  %s3166_s5, 2048, %s2918_s9, [#allocation9], %s2847_s3, %s2847_s3, %s2848_s11  }
  0x48   :  { %2831 = dma.done.wait [#allocation3], 14336  }
  0x49   :  { %2832 = vsyncadd [#allocation3], 4294952960 }
  0x4a   :  { %2833 = dma.done.wait [#allocation6], 16640  }
  0x4b   :  { %2834 = vsyncadd [#allocation6], 4294950656 }
  0x4c   :  { %2835 = dma.done.wait [#allocation9], 2048  }
  0x4d   :  { %2836 = vsyncadd [#allocation9], 4294965248  ;;  %v2510_v0 = vld [vmem:[#allocation5 + $0x104] ss:$8 sps:$4 sm:$0xff]   ;;  %v2512_v1 = vld [vmem:[#allocation5 + $0x100] ss:$8 sps:$4 sm:$0xff]  }
  0x4e   :  { %989 = vmatprep.subr.bf16.mxu0 %v2510_v0  ;;  %v2513_v2 = vld [vmem:[#allocation5 + $0x114] ss:$8 sps:$4 sm:$0xff]   ;;  %v2515_v3 = vld [vmem:[#allocation5 + $0x110] ss:$8 sps:$4 sm:$0xff]   ;;  %v2516_v4 = vld [vmem:[#allocation5 + $0x124] ss:$8 sps:$4 sm:$0xff]  }
  0x4f   :  { %990 = vmatpush1.bf16.msra.mxu0 %v2512_v1  ;;  %v2518_v5 = vld [vmem:[#allocation5 + $0x120] ss:$8 sps:$4 sm:$0xff]   ;;  %v2519_v6 = vld [vmem:[#allocation5 + $0x134] ss:$8 sps:$4 sm:$0xff]   ;;  %v2521_v7 = vld [vmem:[#allocation5 + $0x130] ss:$8 sps:$4 sm:$0xff]  }
  0x50   :  { %991 = vmatprep.subr.bf16.mxu0 %v2513_v2  ;;  %v2522_v8 = vld [vmem:[#allocation5 + $0x144] ss:$8 sps:$4 sm:$0xff]   ;;  %v2524_v9 = vld [vmem:[#allocation5 + $0x140] ss:$8 sps:$4 sm:$0xff]   ;;  %v2525_v10 = vld [vmem:[#allocation5 + $0x154] ss:$8 sps:$4 sm:$0xff]  }
  0x51   :  { %v2527_v11 = vld [vmem:[#allocation5 + $0x150] ss:$8 sps:$4 sm:$0xff]   ;;  %v2528_v12 = vld [vmem:[#allocation5 + $0x164] ss:$8 sps:$4 sm:$0xff]   ;;  %v2530_v16 = vld [vmem:[#allocation5 + $0x160] ss:$8 sps:$4 sm:$0xff]  }
  0x52   :  { %v86_v13 = vld [vmem:[#allocation2 + $0x18] sm:$0xff]  ;;  %v93_v14 = vld [vmem:[#allocation2 + $0x50] sm:$0xff]  ;;  %v2534_v19 = vld [vmem:[#allocation5 + $0x184] ss:$8 sps:$4 sm:$0xff]   ;;  %vm851_vm0 = vcmask 130048  }
  0x53   :  { %992 = vmatpush1.bf16.msra.mxu0 %v2515_v3  ;;  %v198_v15 = vpack.c.bf16 %v93_v14, %v86_v13  ;;  %v2531_v17 = vld [vmem:[#allocation5 + $0x174] ss:$8 sps:$4 sm:$0xff]   ;;  %v2533_v18 = vld [vmem:[#allocation5 + $0x170] ss:$8 sps:$4 sm:$0xff]   ;;  %v2536_v20 = vld [vmem:[#allocation5 + $0x180] ss:$8 sps:$4 sm:$0xff]  }
  0x54   :  { %993 = vmatprep.subr.bf16.mxu0 %v2516_v4  ;;  %v2537_v21 = vld [vmem:[#allocation5 + $0x194] ss:$8 sps:$4 sm:$0xff]   ;;  %v2539_v22 = vld [vmem:[#allocation5 + $0x190] ss:$8 sps:$4 sm:$0xff]   ;;  %v2540_v23 = vld [vmem:[#allocation5 + $0x1a4] ss:$8 sps:$4 sm:$0xff]  }
  0x55   :  { %1021 = vmatprep.mubr.bf16.mxu0 %v198_v15  ;;  %v2542_v24 = vld [vmem:[#allocation5 + $0x1a0] ss:$8 sps:$4 sm:$0xff]   ;;  %v2543_v25 = vld [vmem:[#allocation5 + $0x1b4] ss:$8 sps:$4 sm:$0xff]   ;;  %v2545_v26 = vld [vmem:[#allocation5 + $0x1b0] ss:$8 sps:$4 sm:$0xff]  }
  0x56   :  { %v2546_v27 = vld [vmem:[#allocation5 + $0x1c4] ss:$8 sps:$4 sm:$0xff]   ;;  %v2548_v28 = vld [vmem:[#allocation5 + $0x1c0] ss:$8 sps:$4 sm:$0xff]   ;;  %v2549_v29 = vld [vmem:[#allocation5 + $0x1d4] ss:$8 sps:$4 sm:$0xff]  }
  0x57   :  { %994 = vmatpush1.bf16.msra.mxu0 %v2518_v5  ;;  %v2551_v30 = vld [vmem:[#allocation5 + $0x1d0] ss:$8 sps:$4 sm:$0xff]   ;;  %v2552_v31 = vld [vmem:[#allocation5 + $0x1e4] ss:$8 sps:$4 sm:$0xff]   ;;  %v2608_v33 = vld [vmem:[#allocation5] ss:$8 sps:$4 sm:$0xff]  }
  0x58   :  { %995 = vmatprep.subr.bf16.mxu0 %v2519_v6  ;;  %v2603_v32 = vld [vmem:[#allocation5 + $0x4] ss:$8 sps:$4 sm:$0xff]   ;;  %v2554_v34 = vld [vmem:[#allocation5 + $0x1e0] ss:$8 sps:$4 sm:$0xff]   ;;  %v2555_v35 = vld [vmem:[#allocation5 + $0x1f4] ss:$8 sps:$4 sm:$0xff]  }
  0x59   :  { %876 = vmatprep.subr.bf16.mxu1 %v2603_v32  ;;  %v2609_v36 = vld [vmem:[#allocation5 + $0x14] ss:$8 sps:$4 sm:$0xff]   ;;  %v2557_v37 = vld [vmem:[#allocation5 + $0x1f0] ss:$8 sps:$4 sm:$0xff]   ;;  %v92_v39 = vld [vmem:[#allocation2 + $0x48] sm:$0xff] }
  0x5a   :  { %877 = vmatpush1.bf16.msra.mxu1 %v2608_v33  ;;  %v85_v38 = vld [vmem:[#allocation2 + $0x10] sm:$0xff]  ;;  %v2560_v40 = vld [vmem:[#allocation5 + $0x204] ss:$8 sps:$4 sm:$0xff]   ;;  %v2617_v45 = vld [vmem:[#allocation5 + $0x20] ss:$8 sps:$4 sm:$0xff]  }
  0x5b   :  { %996 = vmatpush1.bf16.msra.mxu0 %v2521_v7  ;;  %878 = vmatprep.subr.bf16.mxu1 %v2609_v36  ;;  %v2614_v41 = vld [vmem:[#allocation5 + $0x10] ss:$8 sps:$4 sm:$0xff]   ;;  %v100_v42 = vld [vmem:[#allocation2 + $0x88] sm:$0xff]  ;;  %v107_v44 = vld [vmem:[#allocation2 + $0xc0] sm:$0xff]  ;;  %v197_v47 = vpack.c.bf16 %v92_v39, %v85_v38 }
  0x5c   :  { %997 = vmatprep.subr.bf16.mxu0 %v2522_v8  ;;  %v2615_v43 = vld [vmem:[#allocation5 + $0x24] ss:$8 sps:$4 sm:$0xff]   ;;  %v2618_v46 = vld [vmem:[#allocation5 + $0x34] ss:$8 sps:$4 sm:$0xff]   ;;  %v2558_v48 = vld [vmem:[#allocation5 + $0x200] ss:$8 sps:$4 sm:$0xff]   ;;  %v205_v49 = vpack.c.bf16 %v107_v44, %v100_v42 }
  0x5d   :  { %v2563_v50 = vld [vmem:[#allocation5 + $0x214] ss:$8 sps:$4 sm:$0xff]   ;;  %v2620_v51 = vld [vmem:[#allocation5 + $0x30] ss:$8 sps:$4 sm:$0xff]   ;;  %v2621_v53 = vld [vmem:[#allocation5 + $0x44] ss:$8 sps:$4 sm:$0xff]  }
  0x5e   :  { %879 = vmatpush1.bf16.msra.mxu1 %v2614_v41  ;;  %v2561_v52 = vld [vmem:[#allocation5 + $0x210] ss:$8 sps:$4 sm:$0xff]   ;;  %v99_v54 = vld [vmem:[#allocation2 + $0x80] sm:$0xff]  ;;  %v2624_v60 = vld [vmem:[#allocation5 + $0x54] ss:$8 sps:$4 sm:$0xff]  }
  0x5f   :  { %998 = vmatpush1.bf16.msra.mxu0 %v2524_v9  ;;  %880 = vmatprep.subr.bf16.mxu1 %v2615_v43  ;;  %v106_v55 = vld [vmem:[#allocation2 + $0xb8] sm:$0xff]  ;;  %v2566_v56 = vld [vmem:[#allocation5 + $0x224] ss:$8 sps:$4 sm:$0xff]   ;;  %v121_v58 = vld [vmem:[#allocation2 + $0x130] sm:$0xff] }
  0x60   :  { %999 = vmatprep.subr.bf16.mxu0 %v2525_v10  ;;  %v114_v57 = vld [vmem:[#allocation2 + $0xf8] sm:$0xff]  ;;  %v2623_v59 = vld [vmem:[#allocation5 + $0x40] ss:$8 sps:$4 sm:$0xff]   ;;  %v204_v61 = vpack.c.bf16 %v106_v55, %v99_v54  ;;  %v2627_v3 = vld [vmem:[#allocation5 + $0x64] ss:$8 sps:$4 sm:$0xff]  }
  0x61   :  { %v2564_v62 = vld [vmem:[#allocation5 + $0x220] ss:$8 sps:$4 sm:$0xff]   ;;  %v212_v63 = vpack.c.bf16 %v121_v58, %v114_v57  ;;  %v2569_v0 = vld [vmem:[#allocation5 + $0x234] ss:$8 sps:$4 sm:$0xff]   ;;  %v2626_v1 = vld [vmem:[#allocation5 + $0x50] ss:$8 sps:$4 sm:$0xff]  }
  0x62   :  { %881 = vmatpush1.bf16.msra.mxu1 %v2617_v45  ;;  %v2567_v2 = vld [vmem:[#allocation5 + $0x230] ss:$8 sps:$4 sm:$0xff]   ;;  %v120_v5 = vld [vmem:[#allocation2 + $0x128] sm:$0xff]  ;;  %v135_v8 = vld [vmem:[#allocation2 + $0x1a0] sm:$0xff] }
  0x63   :  { %1000 = vmatpush1.bf16.msra.mxu0 %v2527_v11  ;;  %882 = vmatprep.subr.bf16.mxu1 %v2618_v46  ;;  %v113_v4 = vld [vmem:[#allocation2 + $0xf0] sm:$0xff]  ;;  %v2572_v6 = vld [vmem:[#allocation5 + $0x244] ss:$8 sps:$4 sm:$0xff]   ;;  %v2629_v9 = vld [vmem:[#allocation5 + $0x60] ss:$8 sps:$4 sm:$0xff]  }
  0x64   :  { %1001 = vmatprep.subr.bf16.mxu0 %v2528_v12  ;;  %v128_v7 = vld [vmem:[#allocation2 + $0x168] sm:$0xff]  ;;  %v2630_v10 = vld [vmem:[#allocation5 + $0x74] ss:$8 sps:$4 sm:$0xff]   ;;  %v211_v11 = vpack.c.bf16 %v120_v5, %v113_v4  ;;  %v2632_v15 = vld [vmem:[#allocation5 + $0x70] ss:$8 sps:$4 sm:$0xff]  }
  0x65   :  { %v2570_v12 = vld [vmem:[#allocation5 + $0x240] ss:$8 sps:$4 sm:$0xff]   ;;  %v219_v13 = vpack.c.bf16 %v135_v8, %v128_v7  ;;  %v2575_v14 = vld [vmem:[#allocation5 + $0x254] ss:$8 sps:$4 sm:$0xff]   ;;  %v2639_v33 = vld [vmem:[#allocation5 + $0xa4] ss:$8 sps:$4 sm:$0xff]  }
  0x66   :  { %883 = vmatpush1.bf16.msra.mxu1 %v2620_v51  ;;  %v148_v36 = vld [vmem:[#allocation2 + $0x208] sm:$0xff]  ;;  %v163_v39 = vld [vmem:[#allocation2 + $0x280] sm:$0xff]  ;;  %v2642_v41 = vld [vmem:[#allocation5 + $0xb4] ss:$8 sps:$4 sm:$0xff]  }
  0x67   :  { %1002 = vmatpush1.bf16.msra.mxu0 %v2530_v16  ;;  %884 = vmatprep.subr.bf16.mxu1 %v2621_v53  ;;  %v2573_v16 = vld [vmem:[#allocation5 + $0x250] ss:$8 sps:$4 sm:$0xff]   ;;  %v156_v38 = vld [vmem:[#allocation2 + $0x248] sm:$0xff]  ;;  %v2587_v45 = vld [vmem:[#allocation5 + $0x294] ss:$8 sps:$4 sm:$0xff]  }
  0x68   :  { %1003 = vmatprep.subr.bf16.mxu0 %v2531_v17  ;;  %v2633_v17 = vld [vmem:[#allocation5 + $0x84] ss:$8 sps:$4 sm:$0xff]   ;;  %v2582_v43 = vld [vmem:[#allocation5 + $0x280] ss:$8 sps:$4 sm:$0xff]   ;;  %v233_v44 = vpack.c.bf16 %v163_v39, %v156_v38  ;;  %v2644_v46 = vld [vmem:[#allocation5 + $0xb0] ss:$8 sps:$4 sm:$0xff]  }
  0x69   :  { %v2590_v51 = vld [vmem:[#allocation5 + $0x2a4] ss:$8 sps:$4 sm:$0xff]   ;;  %v177_v53 = vld [vmem:[#allocation2 + $0x2f0] sm:$0xff]  ;;  %v2647_v54 = vld [vmem:[#allocation5 + $0xc0] ss:$8 sps:$4 sm:$0xff]  }
  0x6a   :  { %885 = vmatpush1.bf16.msra.mxu1 %v2623_v59  ;;  %v2648_v55 = vld [vmem:[#allocation5 + $0xd4] ss:$8 sps:$4 sm:$0xff]   ;;  %v2650_v59 = vld [vmem:[#allocation5 + $0xd0] ss:$8 sps:$4 sm:$0xff]   ;;  %v2653_v4 = vld [vmem:[#allocation5 + $0xe0] ss:$8 sps:$4 sm:$0xff]  }
  0x6b   :  { %1004 = vmatpush1.bf16.msra.mxu0 %v2533_v18  ;;  %886 = vmatprep.subr.bf16.mxu1 %v2624_v60  ;;  %v127_v18 = vld [vmem:[#allocation2 + $0x160] sm:$0xff]  ;;  %v2593_v58 = vld [vmem:[#allocation5 + $0x2b4] ss:$8 sps:$4 sm:$0xff]  }
  0x6c   :  { %1005 = vmatprep.subr.bf16.mxu0 %v2534_v19  ;;  %v134_v19 = vld [vmem:[#allocation2 + $0x198] sm:$0xff]  ;;  %v2613_v38 = vld [vmem:[#allocation5 + $0x304] ss:$8 sps:$4 sm:$0xff]  }
  0x6d   :  { %v2654_v5 = vld [vmem:[#allocation5 + $0xf4] ss:$8 sps:$4 sm:$0xff]  }
  0x6e   :  { %887 = vmatpush1.bf16.msra.mxu1 %v2626_v1  ;;  %v2596_v1 = vld [vmem:[#allocation5 + $0x2c4] ss:$8 sps:$4 sm:$0xff]   ;;  %v2599_v8 = vld [vmem:[#allocation5 + $0x2d4] ss:$8 sps:$4 sm:$0xff]  }
  0x6f   :  { %1006 = vmatpush1.bf16.msra.mxu0 %v2536_v20  ;;  %888 = vmatprep.subr.bf16.mxu1 %v2627_v3  ;;  %v2578_v20 = vld [vmem:[#allocation5 + $0x264] ss:$8 sps:$4 sm:$0xff]   ;;  %v102_v39 = vld [vmem:[#allocation2 + $0x98] sm:$0xff] }
  0x70   :  { %1007 = vmatprep.subr.bf16.mxu0 %v2537_v21  ;;  %v142_v21 = vld [vmem:[#allocation2 + $0x1d8] sm:$0xff]  ;;  %v191_v3 = vld [vmem:[#allocation2 + $0x360] sm:$0xff] }
  0x72   :  { %889 = vmatpush1.bf16.msra.mxu1 %v2629_v9  ;;  %v2656_v9 = vld [vmem:[#allocation5 + $0xf0] ss:$8 sps:$4 sm:$0xff]  }
  0x73   :  { %1008 = vmatpush1.bf16.msra.mxu0 %v2539_v22  ;;  %890 = vmatprep.subr.bf16.mxu1 %v2630_v10  ;;  %v149_v22 = vld [vmem:[#allocation2 + $0x210] sm:$0xff]  ;;  %v83_v10 = vld [vmem:[#allocation2] sm:$0xff] }
  0x74   :  { %1009 = vmatprep.subr.bf16.mxu0 %v2540_v23  ;;  %v2635_v23 = vld [vmem:[#allocation5 + $0x80] ss:$8 sps:$4 sm:$0xff]  }
  0x76   :  { %891 = vmatpush1.bf16.msra.mxu1 %v2632_v15  ;;  %v98_v15 = vld [vmem:[#allocation2 + $0x78] sm:$0xff] }
  0x77   :  { %1010 = vmatpush1.bf16.msra.mxu0 %v2542_v24  ;;  %892 = vmatprep.subr.bf16.mxu1 %v2633_v17  ;;  %v2636_v24 = vld [vmem:[#allocation5 + $0x94] ss:$8 sps:$4 sm:$0xff]  }
  0x78   :  { %1011 = vmatprep.subr.bf16.mxu0 %v2543_v25  ;;  %v218_v25 = vpack.c.bf16 %v134_v19, %v127_v18  ;;  %v190_v17 = vld [vmem:[#allocation2 + $0x358] sm:$0xff]  ;;  %v2602_v18 = vld [vmem:[#allocation5 + $0x2e4] ss:$8 sps:$4 sm:$0xff]  }
  0x79   :  { %v88_v19 = vld [vmem:[#allocation2 + $0x28] sm:$0xff] }
  0x7a   :  { %893 = vmatpush1.bf16.msra.mxu1 %v2635_v23  ;;  %v2600_v23 = vld [vmem:[#allocation5 + $0x2e0] ss:$8 sps:$4 sm:$0xff]  }
  0x7b   :  { %1012 = vmatpush1.bf16.msra.mxu0 %v2545_v26  ;;  %v84_v26 = vld [vmem:[#allocation2 + $0x8] sm:$0xff]  ;;  %894 = vmatprep.subr.bf16.mxu1 %v2636_v24 }
  0x7c   :  { %1013 = vmatprep.subr.bf16.mxu0 %v2546_v27  ;;  %v2576_v27 = vld [vmem:[#allocation5 + $0x260] ss:$8 sps:$4 sm:$0xff]  }
  0x7f   :  { %1014 = vmatpush1.bf16.msra.mxu0 %v2548_v28  ;;  %v226_v28 = vpack.c.bf16 %v149_v22, %v142_v21 }
  0x80   :  { %1015 = vmatprep.subr.bf16.mxu0 %v2549_v29  ;;  %v91_v29 = vld [vmem:[#allocation2 + $0x40] sm:$0xff] }
  0x81   :  { %v196_v32 = vpack.c.bf16 %v91_v29, %v84_v26  ;;  %v97_v26 = vld [vmem:[#allocation2 + $0x70] sm:$0xff]  ;;  %v112_v29 = vld [vmem:[#allocation2 + $0xe8] sm:$0xff] }
  0x83   :  { %1016 = vmatpush1.bf16.msra.mxu0 %v2551_v30  ;;  %v2581_v30 = vld [vmem:[#allocation5 + $0x274] ss:$8 sps:$4 sm:$0xff]   ;;  %908 = vmatprep.mubr.bf16.mxu1 %v196_v32  ;;  %v2657_v32 = vld [vmem:[#allocation7] ss:$8 sps:$4 sm:$0xff]  }
  0x84   :  { %1017 = vmatprep.subr.bf16.mxu0 %v2552_v31  ;;  %v2638_v31 = vld [vmem:[#allocation5 + $0x90] ss:$8 sps:$4 sm:$0xff]  }
  0x85   :  { %895 = vmatpush1.bf16.msra.mxu1 %v2638_v31  ;;  %v2605_v31 = vld [vmem:[#allocation5 + $0x2f0] ss:$8 sps:$4 sm:$0xff]  }
  0x86   :  { %896 = vmatprep.subr.bf16.mxu1 %v2639_v33  ;;  %v2659_v33 = vld [vmem:[#allocation7 + $0x4] ss:$8 sps:$4 sm:$0xff]  }
  0x87   :  { %1018 = vmatpush1.bf16.msra.mxu0 %v2554_v34  ;;  %v2579_v34 = vld [vmem:[#allocation5 + $0x270] ss:$8 sps:$4 sm:$0xff]  }
  0x88   :  { %1019 = vmatprep.subr.bf16.mxu0 %v2555_v35  ;;  %v141_v35 = vld [vmem:[#allocation2 + $0x1d0] sm:$0xff] }
  0x89   :  { %v225_v42 = vpack.c.bf16 %v148_v36, %v141_v35  ;;  %v94_v35 = vld [vmem:[#allocation2 + $0x58] sm:$0xff] }
  0x8b   :  { %1020 = vmatpush1.bf16.msra.mxu0 %v2557_v37  ;;  %v2584_v37 = vld [vmem:[#allocation5 + $0x284] ss:$8 sps:$4 sm:$0xff]  }
  0x8c   :  { %1102 = vmatprep.subr.bf16.mxu0 %v2560_v40  ;;  %v2641_v40 = vld [vmem:[#allocation5 + $0xa0] ss:$8 sps:$4 sm:$0xff]  }
  0x8d   :  { %897 = vmatpush1.bf16.msra.mxu1 %v2641_v40  ;;  %v109_v40 = vld [vmem:[#allocation2 + $0xd0] sm:$0xff] }
  0x8e   :  { %1022 = vmatmul.mubr.bf16.vlgmr.msra.gmra.mrb[0].mxu0 %v197_v47  ;;  %v2585_v47 = vld [vmem:[#allocation5 + $0x290] ss:$8 sps:$4 sm:$0xff]   ;;  %898 = vmatprep.subr.bf16.mxu1 %v2642_v41 }
  0x8f   :  { %1103 = vmatpush1.bf16.msra.mxu0 %v2558_v48  ;;  %1031 = vmatprep.mubr.bf16.mxu0 %v205_v49  ;;  %v155_v48 = vld [vmem:[#allocation2 + $0x240] sm:$0xff]  ;;  %v162_v49 = vld [vmem:[#allocation2 + $0x278] sm:$0xff] }
  0x90   :  { %1104 = vmatprep.subr.bf16.mxu0 %v2563_v50  ;;  %v2645_v50 = vld [vmem:[#allocation5 + $0xc4] ss:$8 sps:$4 sm:$0xff]   ;;  %v232_v57 = vpack.c.bf16 %v162_v49, %v155_v48  ;;  %v118_v48 = vld [vmem:[#allocation2 + $0x118] sm:$0xff]  ;;  %v101_v49 = vld [vmem:[#allocation2 + $0x90] sm:$0xff] }
  0x91   :  { %899 = vmatpush1.bf16.msra.mxu1 %v2644_v46  ;;  %v207_v46 = vpack.c.bf16 %v109_v40, %v102_v39  ;;  %v158_v40 = vld [vmem:[#allocation2 + $0x258] sm:$0xff] }
  0x92   :  { %900 = vmatprep.subr.bf16.mxu1 %v2645_v50  ;;  %v126_v50 = vld [vmem:[#allocation2 + $0x158] sm:$0xff] }
  0x93   :  { %1105 = vmatpush1.bf16.msra.mxu0 %v2561_v52  ;;  %v170_v52 = vld [vmem:[#allocation2 + $0x2b8] sm:$0xff] }
  0x94   :  { %1106 = vmatprep.subr.bf16.mxu0 %v2566_v56  ;;  %v2588_v56 = vld [vmem:[#allocation5 + $0x2a0] ss:$8 sps:$4 sm:$0xff]   ;;  %v240_v60 = vpack.c.bf16 %v177_v53, %v170_v52  ;;  %v2663_v52 = vld [vmem:[#allocation7 + $0x20] ss:$8 sps:$4 sm:$0xff]  }
  0x95   :  { %901 = vmatpush1.bf16.msra.mxu1 %v2647_v54  ;;  %v108_v53 = vld [vmem:[#allocation2 + $0xc8] sm:$0xff] }
  0x96   :  { %1032 = vmatmul.mubr.bf16.gmra.mrb[4].mxu0 %v204_v61  ;;  %v2591_v61 = vld [vmem:[#allocation5 + $0x2b0] ss:$8 sps:$4 sm:$0xff]   ;;  %902 = vmatprep.subr.bf16.mxu1 %v2648_v55  ;;  %v116_v54 = vld [vmem:[#allocation2 + $0x108] sm:$0xff] }
  0x97   :  { %1107 = vmatpush1.bf16.msra.mxu0 %v2564_v62  ;;  %1041 = vmatprep.mubr.bf16.mxu0 %v212_v63  ;;  %v169_v62 = vld [vmem:[#allocation2 + $0x2b0] sm:$0xff]  ;;  %v176_v63 = vld [vmem:[#allocation2 + $0x2e8] sm:$0xff] }
  0x98   :  { %1108 = vmatprep.subr.bf16.mxu0 %v2569_v0  ;;  %v2651_v0 = vld [vmem:[#allocation5 + $0xe4] ss:$8 sps:$4 sm:$0xff]   ;;  %v239_v7 = vpack.c.bf16 %v176_v63, %v169_v62  ;;  %v125_v63 = vld [vmem:[#allocation2 + $0x150] sm:$0xff] }
  0x99   :  { %903 = vmatpush1.bf16.msra.mxu1 %v2650_v59  ;;  %v2668_v55 = vld [vmem:[#allocation7 + $0x34] ss:$8 sps:$4 sm:$0xff]   ;;  %v2666_v59 = vld [vmem:[#allocation7 + $0x30] ss:$8 sps:$4 sm:$0xff]  }
  0x9a   :  { %904 = vmatprep.subr.bf16.mxu1 %v2651_v0  ;;  %v132_v0 = vld [vmem:[#allocation2 + $0x188] sm:$0xff] }
  0x9b   :  { %1109 = vmatpush1.bf16.msra.mxu0 %v2567_v2  ;;  %v184_v2 = vld [vmem:[#allocation2 + $0x328] sm:$0xff] }
  0x9c   :  { %1110 = vmatprep.subr.bf16.mxu0 %v2572_v6  ;;  %v2594_v6 = vld [vmem:[#allocation5 + $0x2c0] ss:$8 sps:$4 sm:$0xff]  }
  0x9d   :  { %905 = vmatpush1.bf16.msra.mxu1 %v2653_v4  ;;  %v2674_v4 = vld [vmem:[#allocation7 + $0x54] ss:$8 sps:$4 sm:$0xff]  }
  0x9e   :  { %1042 = vmatmul.mubr.bf16.gmra.mrb[8].mxu0 %v211_v11  ;;  %v90_v11 = vld [vmem:[#allocation2 + $0x38] sm:$0xff]  ;;  %906 = vmatprep.subr.bf16.mxu1 %v2654_v5  ;;  %v115_v5 = vld [vmem:[#allocation2 + $0x100] sm:$0xff] }
  0x9f   :  { %1111 = vmatpush1.bf16.msra.mxu0 %v2570_v12  ;;  %1051 = vmatprep.mubr.bf16.mxu0 %v219_v13  ;;  %v247_v12 = vpack.c.bf16 %v191_v3, %v184_v2  ;;  %v2597_v13 = vld [vmem:[#allocation5 + $0x2d0] ss:$8 sps:$4 sm:$0xff]   ;;  %v195_v21 = vpack.c.bf16 %v90_v11, %v83_v10  ;;  %v147_v2 = vld [vmem:[#allocation2 + $0x200] sm:$0xff] }
  0xa0   :  { %1112 = vmatprep.subr.bf16.mxu0 %v2575_v14  ;;  %v183_v14 = vld [vmem:[#allocation2 + $0x320] sm:$0xff]  ;;  %v2669_v3 = vld [vmem:[#allocation7 + $0x40] ss:$8 sps:$4 sm:$0xff]  }
  0xa1   :  { %907 = vmatpush1.bf16.msra.mxu1 %v2656_v9  ;;  %v246_v24 = vpack.c.bf16 %v190_v17, %v183_v14  ;;  %v137_v9 = vld [vmem:[#allocation2 + $0x1b0] sm:$0xff]  ;;  %v2672_v11 = vld [vmem:[#allocation7 + $0x50] ss:$8 sps:$4 sm:$0xff]   ;;  %v154_v17 = vld [vmem:[#allocation2 + $0x238] sm:$0xff] }
  0xa2   :  { %1580 = vmatprep.subr.bf16.mxu1 %v2659_v33  ;;  %v168_v33 = vld [vmem:[#allocation2 + $0x2a8] sm:$0xff] }
  0xa3   :  { %1113 = vmatpush1.bf16.msra.mxu0 %v2573_v16  ;;  %v105_v16 = vld [vmem:[#allocation2 + $0xb0] sm:$0xff] }
  0xa4   :  { %1114 = vmatprep.subr.bf16.mxu0 %v2578_v20  ;;  %v95_v20 = vld [vmem:[#allocation2 + $0x60] sm:$0xff]  ;;  %v203_v22 = vpack.c.bf16 %v105_v16, %v98_v15  ;;  %909 = vmatmul.mubr.bf16.vlgmr.msra.gmra.mrb[0].mxu1 %v195_v21  ;;  %v146_v16 = vld [vmem:[#allocation2 + $0x1f8] sm:$0xff]  ;;  %v129_v21 = vld [vmem:[#allocation2 + $0x170] sm:$0xff] }
  0xa5   :  { %1581 = vmatpush1.bf16.msra.mxu1 %v2657_v32  ;;  %v139_v15 = vld [vmem:[#allocation2 + $0x1c0] sm:$0xff]  ;;  %v160_v32 = vld [vmem:[#allocation2 + $0x268] sm:$0xff] }
  0xa6   :  { %1052 = vmatmul.mubr.bf16.gmra.mrb[12].mxu0 %v218_v25  ;;  %v2607_v25 = vld [vmem:[#allocation5 + $0x2f4] ss:$8 sps:$4 sm:$0xff]   ;;  %918 = vmatprep.mubr.bf16.mxu1 %v203_v22  ;;  %v136_v22 = vld [vmem:[#allocation2 + $0x1a8] sm:$0xff] }
  0xa7   :  { %1115 = vmatpush1.bf16.msra.mxu0 %v2576_v27  ;;  %1061 = vmatprep.mubr.bf16.mxu0 %v226_v28  ;;  %v104_v27 = vld [vmem:[#allocation2 + $0xa8] sm:$0xff]  ;;  %v200_v28 = vpack.c.bf16 %v95_v20, %v88_v19  ;;  %v2675_v19 = vld [vmem:[#allocation7 + $0x60] ss:$8 sps:$4 sm:$0xff]  }
  0xa8   :  { %1116 = vmatprep.subr.bf16.mxu0 %v2581_v30  ;;  %v119_v30 = vld [vmem:[#allocation2 + $0x120] sm:$0xff]  ;;  %v202_v36 = vpack.c.bf16 %v104_v27, %v97_v26 }
  0xa9   :  { %v210_v41 = vpack.c.bf16 %v119_v30, %v112_v29  ;;  %v2680_v20 = vld [vmem:[#allocation7 + $0x74] ss:$8 sps:$4 sm:$0xff]   ;;  %v2678_v27 = vld [vmem:[#allocation7 + $0x70] ss:$8 sps:$4 sm:$0xff]   ;;  %v2683_v29 = vld [vmem:[#allocation7 + $0x84] ss:$8 sps:$4 sm:$0xff]  }
  0xab   :  { %1117 = vmatpush1.bf16.msra.mxu0 %v2579_v34  ;;  %v87_v34 = vld [vmem:[#allocation2 + $0x20] sm:$0xff] }
  0xac   :  { %1118 = vmatprep.subr.bf16.mxu0 %v2584_v37  ;;  %v2662_v37 = vld [vmem:[#allocation7 + $0x14] ss:$8 sps:$4 sm:$0xff]   ;;  %919 = vmatmul.mubr.bf16.gmra.mrb[4].mxu1 %v202_v36 }
  0xad   :  { %1582 = vmatprep.subr.bf16.mxu1 %v2662_v37  ;;  %928 = vmatprep.mubr.bf16.mxu1 %v210_v41  ;;  %v2686_v36 = vld [vmem:[#allocation7 + $0x94] ss:$8 sps:$4 sm:$0xff]   ;;  %v165_v41 = vld [vmem:[#allocation2 + $0x290] sm:$0xff] }
  0xae   :  { %1062 = vmatmul.mubr.bf16.gmra.mrb[16].mxu0 %v225_v42  ;;  %v2660_v42 = vld [vmem:[#allocation7 + $0x10] ss:$8 sps:$4 sm:$0xff]  }
  0xaf   :  { %1119 = vmatpush1.bf16.msra.mxu0 %v2582_v43  ;;  %1071 = vmatprep.mubr.bf16.mxu0 %v233_v44  ;;  %v199_v43 = vpack.c.bf16 %v94_v35, %v87_v34  ;;  %v2665_v44 = vld [vmem:[#allocation7 + $0x24] ss:$8 sps:$4 sm:$0xff]   ;;  %v175_v34 = vld [vmem:[#allocation2 + $0x2e0] sm:$0xff]  ;;  %v2681_v35 = vld [vmem:[#allocation7 + $0x80] ss:$8 sps:$4 sm:$0xff]  }
  0xb0   :  { %1120 = vmatprep.subr.bf16.mxu0 %v2587_v45  ;;  %v2611_v45 = vld [vmem:[#allocation5 + $0x300] ss:$8 sps:$4 sm:$0xff]   ;;  %1583 = vmatpush1.bf16.msra.mxu1 %v2660_v42  ;;  %v238_v42 = vpack.c.bf16 %v175_v34, %v168_v33  ;;  %v173_v33 = vld [vmem:[#allocation2 + $0x2d0] sm:$0xff] }
  0xb1   :  { %1584 = vmatprep.subr.bf16.mxu1 %v2665_v44  ;;  %v143_v37 = vld [vmem:[#allocation2 + $0x1e0] sm:$0xff]  ;;  %v180_v34 = vld [vmem:[#allocation2 + $0x308] sm:$0xff] }
  0xb3   :  { %1121 = vmatpush1.bf16.msra.mxu0 %v2585_v47  ;;  %v111_v47 = vld [vmem:[#allocation2 + $0xe0] sm:$0xff] }
  0xb4   :  { %1122 = vmatprep.subr.bf16.mxu0 %v2590_v51  ;;  %v133_v51 = vld [vmem:[#allocation2 + $0x190] sm:$0xff]  ;;  %1585 = vmatpush1.bf16.msra.mxu1 %v2663_v52  ;;  %v2692_v52 = vld [vmem:[#allocation7 + $0xb4] ss:$8 sps:$4 sm:$0xff]  }
  0xb5   :  { %1586 = vmatprep.subr.bf16.mxu1 %v2668_v55 }
  0xb6   :  { %1072 = vmatmul.mubr.bf16.gmra.mrb[20].mxu0 %v232_v57  ;;  %v209_v57 = vpack.c.bf16 %v118_v48, %v111_v47  ;;  %v167_v47 = vld [vmem:[#allocation2 + $0x2a0] sm:$0xff]  ;;  %v174_v48 = vld [vmem:[#allocation2 + $0x2d8] sm:$0xff] }
  0xb7   :  { %1123 = vmatpush1.bf16.msra.mxu0 %v2588_v56  ;;  %1081 = vmatprep.mubr.bf16.mxu0 %v240_v60  ;;  %v123_v56 = vld [vmem:[#allocation2 + $0x140] sm:$0xff]  ;;  %v206_v60 = vpack.c.bf16 %v108_v53, %v101_v49  ;;  %v182_v49 = vld [vmem:[#allocation2 + $0x318] sm:$0xff]  ;;  %v157_v53 = vld [vmem:[#allocation2 + $0x250] sm:$0xff]  ;;  %v237_v55 = vpack.c.bf16 %v174_v48, %v167_v47 }
  0xb8   :  { %1124 = vmatprep.subr.bf16.mxu0 %v2593_v58  ;;  %v217_v58 = vpack.c.bf16 %v133_v51, %v126_v50  ;;  %v214_v62 = vpack.c.bf16 %v123_v56, %v116_v54  ;;  %929 = vmatmul.mubr.bf16.gmra.mrb[8].mxu1 %v209_v57  ;;  %v189_v50 = vld [vmem:[#allocation2 + $0x350] sm:$0xff]  ;;  %v164_v54 = vld [vmem:[#allocation2 + $0x288] sm:$0xff]  ;;  %v179_v57 = vld [vmem:[#allocation2 + $0x300] sm:$0xff] }
  0xb9   :  { %1587 = vmatpush1.bf16.msra.mxu1 %v2666_v59  ;;  %v2687_v51 = vld [vmem:[#allocation7 + $0xa0] ss:$8 sps:$4 sm:$0xff]   ;;  %v172_v56 = vld [vmem:[#allocation2 + $0x2c8] sm:$0xff] }
  0xba   :  { %938 = vmatprep.mubr.bf16.mxu1 %v217_v58  ;;  %v245_v58 = vpack.c.bf16 %v189_v50, %v182_v49  ;;  %v2690_v59 = vld [vmem:[#allocation7 + $0xb0] ss:$8 sps:$4 sm:$0xff]  }
  0xbb   :  { %1125 = vmatpush1.bf16.msra.mxu0 %v2591_v61  ;;  %v2671_v61 = vld [vmem:[#allocation7 + $0x44] ss:$8 sps:$4 sm:$0xff]  }
  0xbc   :  { %1126 = vmatprep.subr.bf16.mxu0 %v2596_v1  ;;  %v140_v1 = vld [vmem:[#allocation2 + $0x1c8] sm:$0xff]  ;;  %1588 = vmatprep.subr.bf16.mxu1 %v2671_v61  ;;  %v2695_v61 = vld [vmem:[#allocation7 + $0xc4] ss:$8 sps:$4 sm:$0xff]  }
  0xbd   :  { %v224_v10 = vpack.c.bf16 %v147_v2, %v140_v1  ;;  %1589 = vmatpush1.bf16.msra.mxu1 %v2669_v3  ;;  %v2693_v1 = vld [vmem:[#allocation7 + $0xc0] ss:$8 sps:$4 sm:$0xff]   ;;  %v171_v2 = vld [vmem:[#allocation2 + $0x2c0] sm:$0xff] }
  0xbe   :  { %1082 = vmatmul.mubr.bf16.gmra.mrb[24].mxu0 %v239_v7  ;;  %v216_v7 = vpack.c.bf16 %v132_v0, %v125_v63  ;;  %1590 = vmatprep.subr.bf16.mxu1 %v2674_v4  ;;  %v181_v63 = vld [vmem:[#allocation2 + $0x310] sm:$0xff]  ;;  %v188_v0 = vld [vmem:[#allocation2 + $0x348] sm:$0xff]  ;;  %v178_v3 = vld [vmem:[#allocation2 + $0x2f8] sm:$0xff] }
  0xbf   :  { %1127 = vmatpush1.bf16.msra.mxu0 %v2594_v6  ;;  %1091 = vmatprep.mubr.bf16.mxu0 %v247_v12  ;;  %v122_v6 = vld [vmem:[#allocation2 + $0x138] sm:$0xff]  ;;  %v244_v4 = vpack.c.bf16 %v188_v0, %v181_v63 }
  0xc0   :  { %1128 = vmatprep.subr.bf16.mxu0 %v2599_v8  ;;  %v130_v8 = vld [vmem:[#allocation2 + $0x178] sm:$0xff]  ;;  %v213_v12 = vpack.c.bf16 %v122_v6, %v115_v5  ;;  %939 = vmatmul.mubr.bf16.gmra.mrb[12].mxu1 %v216_v7  ;;  %v193_v6 = vld [vmem:[#allocation2 + $0x370] sm:$0xff]  ;;  %v241_v7 = vpack.c.bf16 %v178_v3, %v171_v2 }
  0xc1   :  { %v221_v14 = vpack.c.bf16 %v137_v9, %v130_v8  ;;  %948 = vmatprep.mubr.bf16.mxu1 %v224_v10  ;;  %1591 = vmatpush1.bf16.msra.mxu1 %v2672_v11  ;;  %v186_v5 = vld [vmem:[#allocation2 + $0x338] sm:$0xff]  ;;  %v185_v9 = vld [vmem:[#allocation2 + $0x330] sm:$0xff]  ;;  %v192_v10 = vld [vmem:[#allocation2 + $0x368] sm:$0xff] }
  0xc2   :  { %v249_v8 = vpack.c.bf16 %v193_v6, %v186_v5  ;;  %v248_v11 = vpack.c.bf16 %v192_v10, %v185_v9 }
  0xc3   :  { %1129 = vmatpush1.bf16.msra.mxu0 %v2597_v13  ;;  %v2677_v13 = vld [vmem:[#allocation7 + $0x64] ss:$8 sps:$4 sm:$0xff]  }
  0xc4   :  { %1130 = vmatprep.subr.bf16.mxu0 %v2602_v18  ;;  %v161_v18 = vld [vmem:[#allocation2 + $0x270] sm:$0xff]  ;;  %1592 = vmatprep.subr.bf16.mxu1 %v2677_v13 }
  0xc5   :  { %v231_v26 = vpack.c.bf16 %v161_v18, %v154_v17  ;;  %1593 = vmatpush1.bf16.msra.mxu1 %v2675_v19  ;;  %v89_v13 = vld [vmem:[#allocation2 + $0x30] sm:$0xff]  ;;  %v110_v17 = vld [vmem:[#allocation2 + $0xd8] sm:$0xff] }
  0xc6   :  { %1092 = vmatmul.mubr.bf16.gmra.mrb[28].mxu0 %v246_v24  ;;  %v144_v24 = vld [vmem:[#allocation2 + $0x1e8] sm:$0xff]  ;;  %1594 = vmatprep.subr.bf16.mxu1 %v2680_v20  ;;  %v117_v19 = vld [vmem:[#allocation2 + $0x110] sm:$0xff] }
  0xc7   :  { %1131 = vmatpush1.bf16.msra.mxu0 %v2600_v23  ;;  %1134 = vmatprep.mubr.bf16.mxu0 %v200_v28  ;;  %v223_v23 = vpack.c.bf16 %v146_v16, %v139_v15  ;;  %v220_v28 = vpack.c.bf16 %v136_v22, %v129_v21  ;;  %v103_v16 = vld [vmem:[#allocation2 + $0xa0] sm:$0xff]  ;;  %v124_v20 = vld [vmem:[#allocation2 + $0x148] sm:$0xff] }
  0xc8   :  { %1132 = vmatprep.subr.bf16.mxu0 %v2607_v25  ;;  %v151_v25 = vld [vmem:[#allocation2 + $0x220] sm:$0xff]  ;;  %v208_v18 = vpack.c.bf16 %v110_v17, %v103_v16  ;;  %v215_v21 = vpack.c.bf16 %v124_v20, %v117_v19 }
  0xc9   :  { %v228_v30 = vpack.c.bf16 %v151_v25, %v144_v24  ;;  %949 = vmatmul.mubr.bf16.gmra.mrb[16].mxu1 %v223_v23  ;;  %v2696_v22 = vld [vmem:[#allocation7 + $0xd0] ss:$8 sps:$4 sm:$0xff]   ;;  %v2698_v23 = vld [vmem:[#allocation7 + $0xd4] ss:$8 sps:$4 sm:$0xff]   ;;  %v138_v25 = vld [vmem:[#allocation2 + $0x1b8] sm:$0xff] }
  0xca   :  { %958 = vmatprep.mubr.bf16.mxu1 %v231_v26  ;;  %1595 = vmatpush1.bf16.msra.mxu1 %v2678_v27  ;;  %v131_v24 = vld [vmem:[#allocation2 + $0x180] sm:$0xff]  ;;  %v145_v27 = vld [vmem:[#allocation2 + $0x1f0] sm:$0xff] }
  0xcb   :  { %1133 = vmatpush1.bf16.msra.mxu0 %v2605_v31  ;;  %v153_v31 = vld [vmem:[#allocation2 + $0x230] sm:$0xff]  ;;  %1596 = vmatprep.subr.bf16.mxu1 %v2683_v29  ;;  %v222_v26 = vpack.c.bf16 %v138_v25, %v131_v24 }
  0xcc   :  { %1215 = vmatprep.subr.bf16.mxu0 %v2613_v38  ;;  %v150_v38 = vld [vmem:[#allocation2 + $0x218] sm:$0xff]  ;;  %v230_v39 = vpack.c.bf16 %v160_v32, %v153_v31 }
  0xcd   :  { %v227_v44 = vpack.c.bf16 %v150_v38, %v143_v37  ;;  %v166_v31 = vld [vmem:[#allocation2 + $0x298] sm:$0xff] }
  0xce   :  { %1135 = vmatmul.mubr.bf16.vlgmr.msra.gmra.mrb[0].mxu0 %v199_v43  ;;  %1597 = vmatpush1.bf16.msra.mxu1 %v2681_v35  ;;  %v2684_v43 = vld [vmem:[#allocation7 + $0x90] ss:$8 sps:$4 sm:$0xff]   ;;  %v243_v35 = vpack.c.bf16 %v180_v34, %v173_v33  ;;  %v194_v37 = vld [vmem:[#allocation2 + $0x378] sm:$0xff] }
  0xcf   :  { %1216 = vmatpush1.bf16.msra.mxu0 %v2611_v45  ;;  %1144 = vmatprep.mubr.bf16.mxu0 %v207_v46  ;;  %v2689_v45 = vld [vmem:[#allocation7 + $0xa4] ss:$8 sps:$4 sm:$0xff]   ;;  %v235_v46 = vpack.c.bf16 %v165_v41, %v158_v40  ;;  %v2699_v40 = vld [vmem:[#allocation7 + $0xe0] ss:$8 sps:$4 sm:$0xff]   ;;  %v2704_v41 = vld [vmem:[#allocation7 + $0xf4] ss:$8 sps:$4 sm:$0xff]  }
  0xd0   :  { %1598 = vmatprep.subr.bf16.mxu1 %v2686_v36  ;;  %v187_v36 = vld [vmem:[#allocation2 + $0x340] sm:$0xff] }
  0xd1   :  { %959 = vmatmul.mubr.bf16.gmra.mrb[20].mxu1 %v230_v39  ;;  %v250_v38 = vpack.c.bf16 %v194_v37, %v187_v36  ;;  %v2701_v39 = vld [vmem:[#allocation7 + $0xe4] ss:$8 sps:$4 sm:$0xff]  }
  0xd2   :  { %968 = vmatprep.mubr.bf16.mxu1 %v238_v42  ;;  %1599 = vmatpush1.bf16.msra.mxu1 %v2684_v43  ;;  %v2702_v42 = vld [vmem:[#allocation7 + $0xf0] ss:$8 sps:$4 sm:$0xff]  }
  0xd3   :  { %1600 = vmatprep.subr.bf16.mxu1 %v2689_v45 }
  0xd6   :  { %1145 = vmatmul.mubr.bf16.gmra.mrb[4].mxu0 %v206_v60  ;;  %1601 = vmatpush1.bf16.msra.mxu1 %v2687_v51  ;;  %v234_v60 = vpack.c.bf16 %v164_v54, %v157_v53  ;;  %v2705_v51 = vld [vmem:[#allocation8 + $0x40] sm:$0xff]  }
  0xd7   :  { %1154 = vmatprep.mubr.bf16.mxu0 %v214_v62  ;;  %1602 = vmatprep.subr.bf16.mxu1 %v2692_v52  ;;  %v242_v62 = vpack.c.bf16 %v179_v57, %v172_v56 }
  0xd9   :  { %969 = vmatmul.mubr.bf16.gmra.mrb[24].mxu1 %v237_v55 }
  0xda   :  { %978 = vmatprep.mubr.bf16.mxu1 %v245_v58  ;;  %1603 = vmatpush1.bf16.msra.mxu1 %v2690_v59 }
  0xdb   :  { %1604 = vmatprep.subr.bf16.mxu1 %v2695_v61 }
  0xde   :  { %1155 = vmatmul.mubr.bf16.gmra.mrb[8].mxu0 %v213_v12  ;;  %1605 = vmatpush1.bf16.msra.mxu1 %v2693_v1  ;;  %v2849_v12 = vmov 0  }
  0xdf   :  { %1164 = vmatprep.mubr.bf16.mxu0 %v221_v14  ;;  %v96_v14 = vld [vmem:[#allocation2 + $0x68] sm:$0xff]  ;;  %1606 = vmatprep.subr.bf16.mxu1 %v2698_v23 }
  0xe0   :  { %v201_v15 = vpack.c.bf16 %v96_v14, %v89_v13 }
  0xe1   :  { %979 = vmatmul.mubr.bf16.gmra.mrb[28].mxu1 %v244_v4 }
  0xe2   :  { %1607 = vmatpush1.bf16.msra.mxu1 %v2696_v22 }
  0xe3   :  { %1608 = vmatprep.subr.bf16.mxu1 %v2701_v39 }
  0xe6   :  { %1165 = vmatmul.mubr.bf16.gmra.mrb[12].mxu0 %v220_v28  ;;  %v152_v28 = vld [vmem:[#allocation2 + $0x228] sm:$0xff]  ;;  %1609 = vmatpush1.bf16.msra.mxu1 %v2699_v40  ;;  %v2706_v40 = vld [vmem:[#allocation8] sm:$0xff]  }
  0xe7   :  { %1174 = vmatprep.mubr.bf16.mxu0 %v228_v30  ;;  %v229_v29 = vpack.c.bf16 %v152_v28, %v145_v27  ;;  %v159_v30 = vld [vmem:[#allocation2 + $0x260] sm:$0xff]  ;;  %1610 = vmatprep.subr.bf16.mxu1 %v2704_v41 }
  0xe8   :  { %v236_v32 = vpack.c.bf16 %v166_v31, %v159_v30 }
  0xea   :  { %1611 = vmatpush1.bf16.msra.mxu1 %v2702_v42 }
  0xeb   :  { %2306 = vmatprep.subr.bf16.mxu1 %v2705_v51 }
  0xee   :  { %1175 = vmatmul.mubr.bf16.gmra.mrb[16].mxu0 %v227_v44 }
  0xef   :  { %1184 = vmatprep.mubr.bf16.mxu0 %v235_v46 }
  0xf6   :  { %1185 = vmatmul.mubr.bf16.gmra.mrb[20].mxu0 %v234_v60 }
  0xf7   :  { %1194 = vmatprep.mubr.bf16.mxu0 %v242_v62 }
  0xfe   :  { %1195 = vmatmul.mubr.bf16.gmra.mrb[24].mxu0 %v241_v7 }
  0xff   :  { %1204 = vmatprep.mubr.bf16.mxu0 %v249_v8  ;;  %v351_v8 = vlaneseq }
 0x101   :  { %v3011_v13 = vshrl.u32 %v351_v8, 7 }
 0x103   :  { %v353_v14 = vsub.s32 0, %v3011_v13  ;;  %v357_v16 = vsub.s32 1, %v3011_v13 }
 0x106   :  { %1205 = vmatmul.mubr.bf16.gmra.mrb[28].mxu0 %v248_v11 }
 0x107   :  { %1247 = vmatprep.mubr.bf16.mxu0 %v2849_v12 }
 0x10e   :  { %2170 = vmatmul.mubr.msk.bf16.vlgmr.msra.gmra.mrb[0].mxu0 %vm851_vm0, %v201_v15  ;;  %v349_v15 = vld [vmem:[%s3163_s2] sm:$0x3] }
 0x10f   :  { %1257 = vmatprep.mubr.bf16.mxu0 %v2849_v12  ;;  %v3020_v17 = vrot.slane %v349_v15, %v353_v14 }
 0x116   :  { %2171 = vmatmul.mubr.msk.bf16.gmra.mrb[4].mxu0 %vm851_vm0, %v208_v18  ;;  %v3024_v18 = vrot.slane %v349_v15, %v357_v16 }
 0x117   :  { %1267 = vmatprep.mubr.bf16.mxu0 %v2849_v12 }
 0x11e   :  { %2172 = vmatmul.mubr.msk.bf16.gmra.mrb[8].mxu0 %vm851_vm0, %v215_v21 }
 0x11f   :  { %1277 = vmatprep.mubr.bf16.mxu0 %v2849_v12 }
 0x126   :  { %2173 = vmatmul.mubr.msk.bf16.gmra.mrb[12].mxu0 %vm851_vm0, %v222_v26 }
 0x127   :  { %1287 = vmatprep.mubr.bf16.mxu0 %v2849_v12 }
 0x12e   :  { %2174 = vmatmul.mubr.msk.bf16.gmra.mrb[16].mxu0 %vm851_vm0, %v229_v29 }
 0x12f   :  { %1297 = vmatprep.mubr.bf16.mxu0 %v2849_v12 }
 0x136   :  { %2175 = vmatmul.mubr.msk.bf16.gmra.mrb[20].mxu0 %vm851_vm0, %v236_v32 }
 0x137   :  { %1307 = vmatprep.mubr.bf16.mxu0 %v2849_v12 }
 0x13e   :  { %2176 = vmatmul.mubr.msk.bf16.gmra.mrb[24].mxu0 %vm851_vm0, %v243_v35 }
 0x13f   :  { %1317 = vmatprep.mubr.bf16.mxu0 %v2849_v12 }
 0x146   :  { %2177 = vmatmul.mubr.msk.bf16.gmra.mrb[28].mxu0 %vm851_vm0, %v250_v38 }
 0x177   :  { %v910_v43 = vpop.f32.mrb[0].mxu1 }
 0x178   :  { %v912_v44 = vpop.f32.mrb[1].mxu1  ;;  %v911_v19 = vadd.f32 %v910_v43, %v3020_v17 }
 0x179   :  { %v914_v45 = vpop.f32.mrb[2].mxu1  ;;  %v913_v20 = vadd.f32 %v912_v44, %v3024_v18  ;;  %v2707_v44 = vld [vmem:[#allocation8 + $0x48] sm:$0xff]  }
 0x17a   :  { %v916_v46 = vpop.f32.mrb[3].mxu1  ;;  %v915_v22 = vadd.f32 %v914_v45, %v3020_v17 }
 0x17b   :  { %v917_v25 = vadd.f32 %v916_v46, %v3024_v18 }
 0x17f   :  { %v920_v47 = vpop.f32.mrb[4].mxu1 }
 0x180   :  { %v922_v48 = vpop.f32.mrb[5].mxu1  ;;  %v921_v33 = vadd.f32 %v920_v47, %v3020_v17 }
 0x181   :  { %v924_v49 = vpop.f32.mrb[6].mxu1  ;;  %v923_v36 = vadd.f32 %v922_v48, %v3024_v18  ;;  %v2708_v48 = vld [vmem:[#allocation8 + $0x8] sm:$0xff]  }
 0x182   :  { %v926_v50 = vpop.f32.mrb[7].mxu1  ;;  %v925_v41 = vadd.f32 %v924_v49, %v3020_v17  ;;  %v2709_v49 = vld [vmem:[#allocation8 + $0x50] sm:$0xff]  }
 0x183   :  { %v927_v45 = vadd.f32 %v926_v50, %v3024_v18 }
 0x18b   :  { %v2963_v52 = vpop.f32.mrb[8].mxu1 }
 0x18c   :  { %v2965_v53 = vpop.f32.mrb[9].mxu1 }
 0x18d   :  { %v2967_v54 = vpop.f32.mrb[10].mxu1  ;;  %v933_v50 = vadd.f32 %v2965_v53, %v3024_v18 }
 0x18e   :  { %v2969_v55 = vpop.f32.mrb[11].mxu1 }
 0x193   :  { %v2971_v56 = vpop.f32.mrb[12].mxu1 }
 0x194   :  { %v2973_v57 = vpop.f32.mrb[13].mxu1 }
 0x195   :  { %v2975_v58 = vpop.f32.mrb[14].mxu1 }
 0x196   :  { %v2977_v59 = vpop.f32.mrb[15].mxu1 }
 0x19c   :  { %v2979_v60 = vpop.f32.mrb[16].mxu1 }
 0x19d   :  { %v2981_v61 = vpop.f32.mrb[17].mxu1 }
 0x19e   :  { %v2983_v62 = vpop.f32.mrb[18].mxu1 }
 0x19f   :  { %v2985_v63 = vpop.f32.mrb[19].mxu1 }
 0x1a4   :  { %v2987_v0 = vpop.f32.mrb[20].mxu1 }
 0x1a5   :  { %v2989_v1 = vpop.f32.mrb[21].mxu1 }
 0x1a6   :  { %v2991_v2 = vpop.f32.mrb[22].mxu1 }
 0x1a7   :  { %v2993_v3 = vpop.f32.mrb[23].mxu1 }
 0x1ac   :  { %v2995_v4 = vpop.f32.mrb[24].mxu1 }
 0x1ad   :  { %v2997_v5 = vpop.f32.mrb[25].mxu1 }
 0x1ae   :  { %v2999_v6 = vpop.f32.mrb[26].mxu1 }
 0x1af   :  { %v3001_v7 = vpop.f32.mrb[27].mxu1 }
 0x1b4   :  { %v3003_v9 = vpop.f32.mrb[28].mxu1 }
 0x1b5   :  { %v3005_v10 = vpop.f32.mrb[29].mxu1 }
 0x1b6   :  { %v3007_v11 = vpop.f32.mrb[30].mxu1 }
 0x1b7   :  { %v3009_v12 = vpop.f32.mrb[31].mxu1 }
 0x1e1   :  { %v1249_v21 = vpop.f32.mrb[0].mxu0 }
 0x1e2   :  { %v2371_v23 = vadd.f32 %v1249_v21, %v911_v19  ;;  %v1251_v24 = vpop.f32.mrb[1].mxu0  ;;  %v931_v21 = vadd.f32 %v2963_v52, %v3020_v17  ;;  %v937_v52 = vadd.f32 %v2969_v55, %v3024_v18  ;;  %v943_v55 = vadd.f32 %v2973_v57, %v3024_v18 }
 0x1e3   :  { %v2373_v26 = vadd.f32 %v1251_v24, %v913_v20  ;;  %v1253_v27 = vpop.f32.mrb[2].mxu0 }
 0x1e4   :  { %v2375_v28 = vadd.f32 %v1253_v27, %v915_v22  ;;  %v1255_v29 = vpop.f32.mrb[3].mxu0  ;;  %v1328_v31 = vmax.f32 %v2371_v23, 0.0  ;;  %v2710_v27 = vld [vmem:[#allocation8 + $0x10] sm:$0xff]  }
 0x1e5   :  { %v2377_v30 = vadd.f32 %v1255_v29, %v917_v25  ;;  %v1329_v34 = vmax.f32 %v2373_v26, 0.0 }
 0x1e6   :  { %v1330_v32 = vmax.f32 %v2375_v28, 0.0  ;;  %v935_v28 = vadd.f32 %v2967_v54, %v3020_v17  ;;  %v941_v54 = vadd.f32 %v2971_v56, %v3020_v17  ;;  %v947_v56 = vadd.f32 %v2977_v59, %v3024_v18 }
 0x1e7   :  { %v1331_v35 = vmax.f32 %v2377_v30, 0.0  ;;  %v953_v59 = vadd.f32 %v2981_v61, %v3024_v18 }
 0x1e8   :  { %v1360_v37 = vpack.c.bf16 %v1330_v32, %v1328_v31  ;;  %v2711_v31 = vld [vmem:[#allocation8 + $0x58] sm:$0xff]  }
 0x1e9   :  { %v1361_v38 = vpack.c.bf16 %v1331_v35, %v1329_v34  ;;  %v1259_v39 = vpop.f32.mrb[4].mxu0 }
 0x1ea   :  { %v2379_v42 = vadd.f32 %v1259_v39, %v921_v33  ;;  %v1261_v43 = vpop.f32.mrb[5].mxu0  ;;  %v2713_v39 = vld [vmem:[#allocation8 + $0x60] sm:$0xff]  }
 0x1eb   :  { %v2381_v46 = vadd.f32 %v1261_v43, %v923_v36  ;;  %v1263_v51 = vpop.f32.mrb[6].mxu0  ;;  %1612 = vmatprep.mubr.bf16.mxu1 %v1361_v38  ;;  %v2712_v36 = vld [vmem:[#allocation8 + $0x18] sm:$0xff]  }
 0x1ec   :  { %v2383_v8 = vadd.f32 %v1263_v51, %v925_v41  ;;  %v1265_v47 = vpop.f32.mrb[7].mxu0  ;;  %1613 = vmatmul.mubr.bf16.vlgmr.msra.gmra.mrb[32].mxu1 %v1360_v37  ;;  %v1332_v19 = vmax.f32 %v2379_v42, 0.0 }
 0x1ed   :  { %v2385_v15 = vadd.f32 %v1265_v47, %v927_v45  ;;  %2307 = vmatpush3.bf16.msra.mxu1 %v2706_v40  ;;  %v1333_v22 = vmax.f32 %v2381_v46, 0.0  ;;  %v2714_v45 = vld [vmem:[#allocation8 + $0x20] sm:$0xff]   ;;  %v945_v46 = vadd.f32 %v2975_v58, %v3020_v17  ;;  %v2715_v47 = vld [vmem:[#allocation8 + $0x68] sm:$0xff]   ;;  %v951_v58 = vadd.f32 %v2979_v60, %v3020_v17 }
 0x1ee   :  { %v1334_v20 = vmax.f32 %v2383_v8, 0.0  ;;  %2308 = vmatprep.subr.bf16.mxu1 %v2707_v44  ;;  %v957_v60 = vadd.f32 %v2985_v63, %v3024_v18 }
 0x1ef   :  { %v1335_v23 = vmax.f32 %v2385_v15, 0.0 }
 0x1f0   :  { %v1362_v24 = vpack.c.bf16 %v1334_v20, %v1332_v19 }
 0x1f1   :  { %v1363_v25 = vpack.c.bf16 %v1335_v23, %v1333_v22  ;;  %v1269_v26 = vpop.f32.mrb[8].mxu0  ;;  %2309 = vmatpush3.bf16.msra.mxu1 %v2708_v48  ;;  %v2717_v23 = vld [vmem:[#allocation8 + $0x70] sm:$0xff]  }
 0x1f2   :  { %v2387_v29 = vadd.f32 %v1269_v26, %v931_v21  ;;  %v1271_v30 = vpop.f32.mrb[9].mxu0  ;;  %2310 = vmatprep.subr.bf16.mxu1 %v2709_v49  ;;  %v2716_v21 = vld [vmem:[#allocation8 + $0x28] sm:$0xff]  }
 0x1f3   :  { %v2389_v32 = vadd.f32 %v1271_v30, %v933_v50  ;;  %v1273_v33 = vpop.f32.mrb[10].mxu0  ;;  %1622 = vmatprep.mubr.bf16.mxu1 %v1363_v25 }
 0x1f4   :  { %v2391_v34 = vadd.f32 %v1273_v33, %v935_v28  ;;  %v1275_v53 = vpop.f32.mrb[11].mxu0  ;;  %1623 = vmatmul.mubr.bf16.gmra.mrb[36].mxu1 %v1362_v24  ;;  %v1336_v37 = vmax.f32 %v2387_v29, 0.0  ;;  %v2718_v28 = vld [vmem:[#allocation8 + $0x30] sm:$0xff]   ;;  %v955_v29 = vadd.f32 %v2983_v62, %v3020_v17 }
 0x1f5   :  { %v2393_v35 = vadd.f32 %v1275_v53, %v937_v52  ;;  %2311 = vmatpush3.bf16.msra.mxu1 %v2710_v27  ;;  %v1337_v40 = vmax.f32 %v2389_v32, 0.0 }
 0x1f6   :  { %v1338_v38 = vmax.f32 %v2391_v34, 0.0  ;;  %2312 = vmatprep.subr.bf16.mxu1 %v2711_v31 }
 0x1f7   :  { %v1339_v41 = vmax.f32 %v2393_v35, 0.0 }
 0x1f8   :  { %v1364_v42 = vpack.c.bf16 %v1338_v38, %v1336_v37  ;;  %v963_v38 = vadd.f32 %v2989_v1, %v3024_v18 }
 0x1f9   :  { %v1365_v43 = vpack.c.bf16 %v1339_v41, %v1337_v40  ;;  %v1279_v44 = vpop.f32.mrb[12].mxu0  ;;  %2313 = vmatpush3.bf16.msra.mxu1 %v2712_v36  ;;  %v961_v36 = vadd.f32 %v2987_v0, %v3020_v17  ;;  %v965_v40 = vadd.f32 %v2991_v2, %v3020_v17  ;;  %v973_v2 = vadd.f32 %v2997_v5, %v3024_v18 }
 0x1fa   :  { %v2395_v51 = vadd.f32 %v1279_v44, %v941_v54  ;;  %v1281_v8 = vpop.f32.mrb[13].mxu0  ;;  %2314 = vmatprep.subr.bf16.mxu1 %v2713_v39 }
 0x1fb   :  { %v2397_v15 = vadd.f32 %v1281_v8, %v943_v55  ;;  %v1283_v48 = vpop.f32.mrb[14].mxu0  ;;  %1632 = vmatprep.mubr.bf16.mxu1 %v1365_v43  ;;  %v971_v8 = vadd.f32 %v2995_v4, %v3020_v17 }
 0x1fc   :  { %v2399_v19 = vadd.f32 %v1283_v48, %v945_v46  ;;  %v1285_v57 = vpop.f32.mrb[15].mxu0  ;;  %1633 = vmatmul.mubr.bf16.gmra.mrb[40].mxu1 %v1364_v42  ;;  %v1340_v49 = vmax.f32 %v2395_v51, 0.0  ;;  %v967_v42 = vadd.f32 %v2993_v3, %v3024_v18 }
 0x1fd   :  { %v2401_v20 = vadd.f32 %v1285_v57, %v947_v56  ;;  %2315 = vmatpush3.bf16.msra.mxu1 %v2714_v45  ;;  %v1341_v50 = vmax.f32 %v2397_v15, 0.0 }
 0x1fe   :  { %v1342_v22 = vmax.f32 %v2399_v19, 0.0  ;;  %2316 = vmatprep.subr.bf16.mxu1 %v2715_v47  ;;  %v975_v19 = vadd.f32 %v2999_v6, %v3020_v17  ;;  %v983_v6 = vadd.f32 %v3005_v10, %v3024_v18 }
 0x1ff   :  { %v1343_v24 = vmax.f32 %v2401_v20, 0.0 }
 0x200   :  { %v1366_v25 = vpack.c.bf16 %v1342_v22, %v1340_v49 }
 0x201   :  { %v1367_v26 = vpack.c.bf16 %v1343_v24, %v1341_v50  ;;  %v1289_v27 = vpop.f32.mrb[16].mxu0  ;;  %2317 = vmatpush3.bf16.msra.mxu1 %v2716_v21  ;;  %v977_v21 = vadd.f32 %v3001_v7, %v3024_v18  ;;  %v981_v24 = vadd.f32 %v3003_v9, %v3020_v17 }
 0x202   :  { %v2403_v30 = vadd.f32 %v1289_v27, %v951_v58  ;;  %v1291_v31 = vpop.f32.mrb[17].mxu0  ;;  %2318 = vmatprep.subr.bf16.mxu1 %v2717_v23 }
 0x203   :  { %v2405_v52 = vadd.f32 %v1291_v31, %v953_v59  ;;  %v1293_v32 = vpop.f32.mrb[18].mxu0  ;;  %1642 = vmatprep.mubr.bf16.mxu1 %v1367_v26  ;;  %v987_v31 = vadd.f32 %v3009_v12, %v3024_v18  ;;  %v1408_v12 = vld [vmem:[%s3165_s4] sm:$0x3] }
 0x204   :  { %v2407_v33 = vadd.f32 %v1293_v32, %v955_v29  ;;  %v1295_v34 = vpop.f32.mrb[19].mxu0  ;;  %1643 = vmatmul.mubr.bf16.gmra.mrb[44].mxu1 %v1366_v25  ;;  %v1344_v53 = vmax.f32 %v2403_v30, 0.0  ;;  %v3087_v18 = vrot.slane %v1408_v12, %v353_v14 }
 0x205   :  { %v2409_v61 = vadd.f32 %v1295_v34, %v957_v60  ;;  %2319 = vmatpush3.bf16.msra.mxu1 %v2718_v28  ;;  %v1345_v62 = vmax.f32 %v2405_v52, 0.0  ;;  %v985_v28 = vadd.f32 %v3007_v11, %v3020_v17  ;;  %v2719_v11 = vld [vmem:[#allocation8 + $0x78] sm:$0xff]  }
 0x206   :  { %v1346_v35 = vmax.f32 %v2407_v33, 0.0  ;;  %v2720_v17 = vld [vmem:[#allocation8 + $0x38] sm:$0xff]   ;;  %2320 = vmatprep.subr.bf16.mxu1 %v2719_v11 }
 0x207   :  { %v1347_v37 = vmax.f32 %v2409_v61, 0.0 }
 0x208   :  { %v1368_v54 = vpack.c.bf16 %v1346_v35, %v1344_v53 }
 0x209   :  { %v1369_v63 = vpack.c.bf16 %v1347_v37, %v1345_v62  ;;  %v1299_v39 = vpop.f32.mrb[20].mxu0  ;;  %2321 = vmatpush3.bf16.msra.mxu1 %v2720_v17  ;;  %v3091_v62 = vrot.slane %v1408_v12, %v357_v16 }
 0x20a   :  { %v2411_v41 = vadd.f32 %v1299_v39, %v961_v36  ;;  %v1301_v55 = vpop.f32.mrb[21].mxu0 }
 0x20b   :  { %v2413_v43 = vadd.f32 %v1301_v55, %v963_v38  ;;  %v1303_v44 = vpop.f32.mrb[22].mxu0  ;;  %1652 = vmatprep.mubr.bf16.mxu1 %v1369_v63 }
 0x20c   :  { %v2415_v0 = vadd.f32 %v1303_v44, %v965_v40  ;;  %v1305_v45 = vpop.f32.mrb[23].mxu0  ;;  %1653 = vmatmul.mubr.bf16.gmra.mrb[48].mxu1 %v1368_v54  ;;  %v1348_v51 = vmax.f32 %v2411_v41, 0.0 }
 0x20d   :  { %v2417_v46 = vadd.f32 %v1305_v45, %v967_v42  ;;  %v1349_v47 = vmax.f32 %v2413_v43, 0.0 }
 0x20e   :  { %v1350_v1 = vmax.f32 %v2415_v0, 0.0 }
 0x20f   :  { %v1351_v56 = vmax.f32 %v2417_v46, 0.0 }
 0x210   :  { %v1370_v15 = vpack.c.bf16 %v1350_v1, %v1348_v51 }
 0x211   :  { %v1371_v48 = vpack.c.bf16 %v1351_v56, %v1349_v47  ;;  %v1309_v3 = vpop.f32.mrb[24].mxu0 }
 0x212   :  { %v2419_v57 = vadd.f32 %v1309_v3, %v971_v8  ;;  %v1311_v20 = vpop.f32.mrb[25].mxu0 }
 0x213   :  { %v2421_v49 = vadd.f32 %v1311_v20, %v973_v2  ;;  %v1313_v22 = vpop.f32.mrb[26].mxu0  ;;  %1662 = vmatprep.mubr.bf16.mxu1 %v1371_v48 }
 0x214   :  { %v2423_v4 = vadd.f32 %v1313_v22, %v975_v19  ;;  %v1315_v58 = vpop.f32.mrb[27].mxu0  ;;  %1663 = vmatmul.mubr.bf16.gmra.mrb[52].mxu1 %v1370_v15  ;;  %v1352_v50 = vmax.f32 %v2419_v57, 0.0 }
 0x215   :  { %v2425_v23 = vadd.f32 %v1315_v58, %v977_v21  ;;  %v1353_v59 = vmax.f32 %v2421_v49, 0.0 }
 0x216   :  { %v1354_v5 = vmax.f32 %v2423_v4, 0.0 }
 0x217   :  { %v1355_v25 = vmax.f32 %v2425_v23, 0.0 }
 0x218   :  { %v1372_v26 = vpack.c.bf16 %v1354_v5, %v1352_v50 }
 0x219   :  { %v1373_v27 = vpack.c.bf16 %v1355_v25, %v1353_v59  ;;  %v1319_v7 = vpop.f32.mrb[28].mxu0 }
 0x21a   :  { %v2427_v29 = vadd.f32 %v1319_v7, %v981_v24  ;;  %v1321_v30 = vpop.f32.mrb[29].mxu0 }
 0x21b   :  { %v2429_v60 = vadd.f32 %v1321_v30, %v983_v6  ;;  %v1323_v52 = vpop.f32.mrb[30].mxu0  ;;  %1672 = vmatprep.mubr.bf16.mxu1 %v1373_v27 }
 0x21c   :  { %v2431_v9 = vadd.f32 %v1323_v52, %v985_v28  ;;  %v1325_v32 = vpop.f32.mrb[31].mxu0  ;;  %1673 = vmatmul.mubr.bf16.gmra.mrb[56].mxu1 %v1372_v26  ;;  %v1356_v34 = vmax.f32 %v2427_v29, 0.0 }
 0x21d   :  { %v2433_v33 = vadd.f32 %v1325_v32, %v987_v31  ;;  %v1357_v61 = vmax.f32 %v2429_v60, 0.0 }
 0x21e   :  { %v1358_v10 = vmax.f32 %v2431_v9, 0.0 }
 0x21f   :  { %v1359_v53 = vmax.f32 %v2433_v33, 0.0 }
 0x220   :  { %v1374_v35 = vpack.c.bf16 %v1358_v10, %v1356_v34 }
 0x221   :  { %v1375_v36 = vpack.c.bf16 %v1359_v53, %v1357_v61 }
 0x223   :  { %1682 = vmatprep.mubr.bf16.mxu1 %v1375_v36 }
 0x224   :  { %1683 = vmatmul.mubr.bf16.gmra.mrb[60].mxu1 %v1374_v35 }
 0x2bf   :  { %v1614_v37 = vpop.f32.mrb[32].mxu1 }
 0x2c0   :  { %v1615_v38 = vadd.f32 %v1614_v37, %v3087_v18  ;;  %v1616_v54 = vpop.f32.mrb[33].mxu1 }
 0x2c1   :  { %v1617_v63 = vadd.f32 %v1616_v54, %v3091_v62  ;;  %v1618_v39 = vpop.f32.mrb[34].mxu1 }
 0x2c2   :  { %v1619_v40 = vadd.f32 %v1618_v39, %v3087_v18  ;;  %v1620_v41 = vpop.f32.mrb[35].mxu1  ;;  %v1693_v42 = vmax.f32 %v1615_v38, 0.0 }
 0x2c3   :  { %v1621_v55 = vadd.f32 %v1620_v41, %v3091_v62  ;;  %v1694_v14 = vmax.f32 %v1617_v63, 0.0 }
 0x2c4   :  { %v1695_v43 = vmax.f32 %v1619_v40, 0.0 }
 0x2c5   :  { %v1696_v44 = vmax.f32 %v1621_v55, 0.0 }
 0x2c6   :  { %v1725_v0 = vpack.c.bf16 %v1695_v43, %v1693_v42 }
 0x2c7   :  { %v1726_v13 = vpack.c.bf16 %v1696_v44, %v1694_v14  ;;  %v1624_v16 = vpop.f32.mrb[36].mxu1 }
 0x2c8   :  { %v1625_v45 = vadd.f32 %v1624_v16, %v3087_v18  ;;  %v1626_v46 = vpop.f32.mrb[37].mxu1 }
 0x2c9   :  { %v1627_v51 = vadd.f32 %v1626_v46, %v3091_v62  ;;  %v1628_v1 = vpop.f32.mrb[38].mxu1  ;;  %1908 = vmatprep.mubr.bf16.mxu1 %v1726_v13 }
 0x2ca   :  { %v1629_v8 = vadd.f32 %v1628_v1, %v3087_v18  ;;  %v1630_v47 = vpop.f32.mrb[39].mxu1  ;;  %1909 = vmatmul.mubr.bf16.vlgmr.msra.gmra.mrb[64].mxu1 %v1725_v0  ;;  %v1697_v2 = vmax.f32 %v1625_v45, 0.0 }
 0x2cb   :  { %v1631_v56 = vadd.f32 %v1630_v47, %v3091_v62  ;;  %v1698_v48 = vmax.f32 %v1627_v51, 0.0 }
 0x2cc   :  { %v1699_v15 = vmax.f32 %v1629_v8, 0.0 }
 0x2cd   :  { %v1700_v3 = vmax.f32 %v1631_v56, 0.0 }
 0x2ce   :  { %v1727_v19 = vpack.c.bf16 %v1699_v15, %v1697_v2 }
 0x2cf   :  { %v1728_v57 = vpack.c.bf16 %v1700_v3, %v1698_v48  ;;  %v1634_v20 = vpop.f32.mrb[40].mxu1 }
 0x2d0   :  { %v1635_v21 = vadd.f32 %v1634_v20, %v3087_v18  ;;  %v1636_v49 = vpop.f32.mrb[41].mxu1 }
 0x2d1   :  { %v1637_v22 = vadd.f32 %v1636_v49, %v3091_v62  ;;  %v1638_v4 = vpop.f32.mrb[42].mxu1  ;;  %1916 = vmatprep.mubr.bf16.mxu1 %v1728_v57 }
 0x2d2   :  { %v1639_v58 = vadd.f32 %v1638_v4, %v3087_v18  ;;  %v1640_v23 = vpop.f32.mrb[43].mxu1  ;;  %1917 = vmatmul.mubr.bf16.gmra.mrb[68].mxu1 %v1727_v19  ;;  %v1701_v5 = vmax.f32 %v1635_v21, 0.0 }
 0x2d3   :  { %v1641_v50 = vadd.f32 %v1640_v23, %v3091_v62  ;;  %v1702_v59 = vmax.f32 %v1637_v22, 0.0 }
 0x2d4   :  { %v1703_v24 = vmax.f32 %v1639_v58, 0.0 }
 0x2d5   :  { %v1704_v25 = vmax.f32 %v1641_v50, 0.0 }
 0x2d6   :  { %v1729_v6 = vpack.c.bf16 %v1703_v24, %v1701_v5 }
 0x2d7   :  { %v1730_v26 = vpack.c.bf16 %v1704_v25, %v1702_v59  ;;  %v1644_v27 = vpop.f32.mrb[44].mxu1 }
 0x2d8   :  { %v1645_v7 = vadd.f32 %v1644_v27, %v3087_v18  ;;  %v1646_v28 = vpop.f32.mrb[45].mxu1 }
 0x2d9   :  { %v1647_v29 = vadd.f32 %v1646_v28, %v3091_v62  ;;  %v1648_v30 = vpop.f32.mrb[46].mxu1  ;;  %1924 = vmatprep.mubr.bf16.mxu1 %v1730_v26 }
 0x2da   :  { %v1649_v31 = vadd.f32 %v1648_v30, %v3087_v18  ;;  %v1650_v60 = vpop.f32.mrb[47].mxu1  ;;  %1925 = vmatmul.mubr.bf16.gmra.mrb[72].mxu1 %v1729_v6  ;;  %v1705_v9 = vmax.f32 %v1645_v7, 0.0 }
 0x2db   :  { %v1651_v52 = vadd.f32 %v1650_v60, %v3091_v62  ;;  %v1706_v33 = vmax.f32 %v1647_v29, 0.0 }
 0x2dc   :  { %v1707_v32 = vmax.f32 %v1649_v31, 0.0 }
 0x2dd   :  { %v1708_v34 = vmax.f32 %v1651_v52, 0.0 }
 0x2de   :  { %v1731_v10 = vpack.c.bf16 %v1707_v32, %v1705_v9 }
 0x2df   :  { %v1732_v61 = vpack.c.bf16 %v1708_v34, %v1706_v33  ;;  %v1654_v53 = vpop.f32.mrb[48].mxu1 }
 0x2e0   :  { %v1655_v35 = vadd.f32 %v1654_v53, %v3087_v18  ;;  %v1656_v36 = vpop.f32.mrb[49].mxu1 }
 0x2e1   :  { %v1657_v11 = vadd.f32 %v1656_v36, %v3091_v62  ;;  %v1658_v17 = vpop.f32.mrb[50].mxu1  ;;  %1932 = vmatprep.mubr.bf16.mxu1 %v1732_v61 }
 0x2e2   :  { %v1659_v12 = vadd.f32 %v1658_v17, %v3087_v18  ;;  %v1660_v37 = vpop.f32.mrb[51].mxu1  ;;  %1933 = vmatmul.mubr.bf16.gmra.mrb[76].mxu1 %v1731_v10  ;;  %v1709_v54 = vmax.f32 %v1655_v35, 0.0 }
 0x2e3   :  { %v1661_v38 = vadd.f32 %v1660_v37, %v3091_v62  ;;  %v1710_v39 = vmax.f32 %v1657_v11, 0.0 }
 0x2e4   :  { %v1711_v63 = vmax.f32 %v1659_v12, 0.0 }
 0x2e5   :  { %v1712_v40 = vmax.f32 %v1661_v38, 0.0 }
 0x2e6   :  { %v1733_v41 = vpack.c.bf16 %v1711_v63, %v1709_v54 }
 0x2e7   :  { %v1734_v55 = vpack.c.bf16 %v1712_v40, %v1710_v39  ;;  %v1664_v42 = vpop.f32.mrb[52].mxu1 }
 0x2e8   :  { %v1665_v43 = vadd.f32 %v1664_v42, %v3087_v18  ;;  %v1666_v14 = vpop.f32.mrb[53].mxu1 }
 0x2e9   :  { %v1667_v44 = vadd.f32 %v1666_v14, %v3091_v62  ;;  %v1668_v0 = vpop.f32.mrb[54].mxu1  ;;  %1940 = vmatprep.mubr.bf16.mxu1 %v1734_v55 }
 0x2ea   :  { %v1669_v13 = vadd.f32 %v1668_v0, %v3087_v18  ;;  %v1670_v16 = vpop.f32.mrb[55].mxu1  ;;  %1941 = vmatmul.mubr.bf16.gmra.mrb[80].mxu1 %v1733_v41  ;;  %v1713_v46 = vmax.f32 %v1665_v43, 0.0 }
 0x2eb   :  { %v1671_v45 = vadd.f32 %v1670_v16, %v3091_v62  ;;  %v1714_v1 = vmax.f32 %v1667_v44, 0.0 }
 0x2ec   :  { %v1715_v51 = vmax.f32 %v1669_v13, 0.0 }
 0x2ed   :  { %v1716_v8 = vmax.f32 %v1671_v45, 0.0 }
 0x2ee   :  { %v1735_v47 = vpack.c.bf16 %v1715_v51, %v1713_v46 }
 0x2ef   :  { %v1736_v56 = vpack.c.bf16 %v1716_v8, %v1714_v1  ;;  %v1674_v2 = vpop.f32.mrb[56].mxu1 }
 0x2f0   :  { %v1675_v15 = vadd.f32 %v1674_v2, %v3087_v18  ;;  %v1676_v48 = vpop.f32.mrb[57].mxu1 }
 0x2f1   :  { %v1677_v3 = vadd.f32 %v1676_v48, %v3091_v62  ;;  %v1678_v19 = vpop.f32.mrb[58].mxu1  ;;  %1948 = vmatprep.mubr.bf16.mxu1 %v1736_v56 }
 0x2f2   :  { %v1679_v57 = vadd.f32 %v1678_v19, %v3087_v18  ;;  %v1680_v20 = vpop.f32.mrb[59].mxu1  ;;  %1949 = vmatmul.mubr.bf16.gmra.mrb[84].mxu1 %v1735_v47  ;;  %v1717_v49 = vmax.f32 %v1675_v15, 0.0 }
 0x2f3   :  { %v1681_v21 = vadd.f32 %v1680_v20, %v3091_v62  ;;  %v1718_v4 = vmax.f32 %v1677_v3, 0.0 }
 0x2f4   :  { %v1719_v22 = vmax.f32 %v1679_v57, 0.0 }
 0x2f5   :  { %v1720_v58 = vmax.f32 %v1681_v21, 0.0 }
 0x2f6   :  { %v1737_v23 = vpack.c.bf16 %v1719_v22, %v1717_v49 }
 0x2f7   :  { %v1738_v50 = vpack.c.bf16 %v1720_v58, %v1718_v4  ;;  %v1684_v5 = vpop.f32.mrb[60].mxu1 }
 0x2f8   :  { %v1685_v24 = vadd.f32 %v1684_v5, %v3087_v18  ;;  %v1686_v59 = vpop.f32.mrb[61].mxu1 }
 0x2f9   :  { %v1687_v25 = vadd.f32 %v1686_v59, %v3091_v62  ;;  %v1688_v6 = vpop.f32.mrb[62].mxu1  ;;  %1956 = vmatprep.mubr.bf16.mxu1 %v1738_v50 }
 0x2fa   :  { %v1689_v26 = vadd.f32 %v1688_v6, %v3087_v18  ;;  %v1690_v27 = vpop.f32.mrb[63].mxu1  ;;  %1957 = vmatmul.mubr.bf16.gmra.mrb[88].mxu1 %v1737_v23  ;;  %v1721_v28 = vmax.f32 %v1685_v24, 0.0  ;;  %v3128_v18 = vld [vmem:[%s3167_s6] ss:$0 sm:$0xff] }
 0x2fb   :  { %v1691_v7 = vadd.f32 %v1690_v27, %v3091_v62  ;;  %v1722_v30 = vmax.f32 %v1687_v25, 0.0 }
 0x2fc   :  { %v1723_v29 = vmax.f32 %v1689_v26, 0.0 }
 0x2fd   :  { %v1724_v31 = vmax.f32 %v1691_v7, 0.0 }
 0x2fe   :  { %v1739_v60 = vpack.c.bf16 %v1723_v29, %v1721_v28 }
 0x2ff   :  { %v1740_v52 = vpack.c.bf16 %v1724_v31, %v1722_v30 }
 0x301   :  { %1964 = vmatprep.mubr.bf16.mxu1 %v1740_v52 }
 0x302   :  { %1965 = vmatmul.mubr.bf16.gmra.mrb[92].mxu1 %v1739_v60 }
 0x39d   :  { %v2322_v9 = vpop.f32.mrb[64].mxu1 }
 0x39e   :  { %v2323_v32 = vpop.f32.mrb[65].mxu1 }
 0x39f   :  { %v2324_v33 = vadd.f32 %v2323_v32, %v2322_v9  ;;  %v2325_v34 = vpop.f32.mrb[66].mxu1 }
 0x3a0   :  { %v2326_v10 = vpop.f32.mrb[67].mxu1 }
 0x3a1   :  { %v2327_v61 = vadd.f32 %v2326_v10, %v2325_v34  ;;  %v1911_v62 = vadd.f32 %v2324_v33, %v3128_v18 }
 0x3a3   :  { %v1914_v53 = vadd.f32 %v2327_v61, %v3128_v18 }
 0x3a5   :  { %v2262_v35 = vpack.c.bf16 %v1914_v53, %v1911_v62  ;;  %v2328_v36 = vpop.f32.mrb[68].mxu1 }
 0x3a6   :  { %v2329_v11 = vpop.f32.mrb[69].mxu1 }
 0x3a7   :  { %2263 = vst [vmem:[#allocation10] sm:$0xff] %v2262_v35   ;;  %v2330_v17 = vadd.f32 %v2329_v11, %v2328_v36  ;;  %v2331_v12 = vpop.f32.mrb[70].mxu1 }
 0x3a8   :  { %v2332_v37 = vpop.f32.mrb[71].mxu1 }
 0x3a9   :  { %v2333_v38 = vadd.f32 %v2332_v37, %v2331_v12  ;;  %v1919_v54 = vadd.f32 %v2330_v17, %v3128_v18 }
 0x3ab   :  { %v1922_v63 = vadd.f32 %v2333_v38, %v3128_v18 }
 0x3ad   :  { %v2267_v39 = vpack.c.bf16 %v1922_v63, %v1919_v54  ;;  %v2334_v40 = vpop.f32.mrb[72].mxu1 }
 0x3ae   :  { %v2335_v41 = vpop.f32.mrb[73].mxu1 }
 0x3af   :  { %2299 = vst [vmem:[#allocation10 + $0x8] sm:$0xff] %v2267_v39   ;;  %v2336_v55 = vadd.f32 %v2335_v41, %v2334_v40  ;;  %v2337_v42 = vpop.f32.mrb[74].mxu1 }
 0x3b0   :  { %v2338_v43 = vpop.f32.mrb[75].mxu1 }
 0x3b1   :  { %v2339_v14 = vadd.f32 %v2338_v43, %v2337_v42  ;;  %v1927_v44 = vadd.f32 %v2336_v55, %v3128_v18 }
 0x3b3   :  { %v1930_v0 = vadd.f32 %v2339_v14, %v3128_v18 }
 0x3b5   :  { %v2272_v13 = vpack.c.bf16 %v1930_v0, %v1927_v44  ;;  %v2340_v16 = vpop.f32.mrb[76].mxu1 }
 0x3b6   :  { %v2341_v45 = vpop.f32.mrb[77].mxu1 }
 0x3b7   :  { %2300 = vst [vmem:[#allocation10 + $0x10] sm:$0xff] %v2272_v13   ;;  %v2342_v46 = vadd.f32 %v2341_v45, %v2340_v16  ;;  %v2343_v51 = vpop.f32.mrb[78].mxu1 }
 0x3b8   :  { %v2344_v1 = vpop.f32.mrb[79].mxu1 }
 0x3b9   :  { %v2345_v8 = vadd.f32 %v2344_v1, %v2343_v51  ;;  %v1935_v47 = vadd.f32 %v2342_v46, %v3128_v18 }
 0x3bb   :  { %v1938_v56 = vadd.f32 %v2345_v8, %v3128_v18 }
 0x3bd   :  { %v2277_v2 = vpack.c.bf16 %v1938_v56, %v1935_v47  ;;  %v2346_v15 = vpop.f32.mrb[80].mxu1 }
 0x3be   :  { %v2347_v48 = vpop.f32.mrb[81].mxu1 }
 0x3bf   :  { %2301 = vst [vmem:[#allocation10 + $0x18] sm:$0xff] %v2277_v2   ;;  %v2348_v3 = vadd.f32 %v2347_v48, %v2346_v15  ;;  %v2349_v19 = vpop.f32.mrb[82].mxu1 }
 0x3c0   :  { %v2350_v57 = vpop.f32.mrb[83].mxu1 }
 0x3c1   :  { %v2351_v20 = vadd.f32 %v2350_v57, %v2349_v19  ;;  %v1943_v21 = vadd.f32 %v2348_v3, %v3128_v18 }
 0x3c3   :  { %v1946_v49 = vadd.f32 %v2351_v20, %v3128_v18 }
 0x3c5   :  { %v2282_v22 = vpack.c.bf16 %v1946_v49, %v1943_v21  ;;  %v2352_v4 = vpop.f32.mrb[84].mxu1 }
 0x3c6   :  { %v2353_v58 = vpop.f32.mrb[85].mxu1 }
 0x3c7   :  { %2302 = vst [vmem:[#allocation10 + $0x20] sm:$0xff] %v2282_v22   ;;  %v2354_v23 = vadd.f32 %v2353_v58, %v2352_v4  ;;  %v2355_v50 = vpop.f32.mrb[86].mxu1 }
 0x3c8   :  { %v2356_v5 = vpop.f32.mrb[87].mxu1 }
 0x3c9   :  { %v2357_v24 = vadd.f32 %v2356_v5, %v2355_v50  ;;  %v1951_v59 = vadd.f32 %v2354_v23, %v3128_v18 }
 0x3cb   :  { %v1954_v25 = vadd.f32 %v2357_v24, %v3128_v18 }
 0x3cd   :  { %v2287_v6 = vpack.c.bf16 %v1954_v25, %v1951_v59  ;;  %v2358_v26 = vpop.f32.mrb[88].mxu1 }
 0x3ce   :  { %v2359_v27 = vpop.f32.mrb[89].mxu1 }
 0x3cf   :  { %2303 = vst [vmem:[#allocation10 + $0x28] sm:$0xff] %v2287_v6   ;;  %v2360_v7 = vadd.f32 %v2359_v27, %v2358_v26  ;;  %v2361_v28 = vpop.f32.mrb[90].mxu1 }
 0x3d0   :  { %v2362_v29 = vpop.f32.mrb[91].mxu1 }
 0x3d1   :  { %v2363_v30 = vadd.f32 %v2362_v29, %v2361_v28  ;;  %v1959_v31 = vadd.f32 %v2360_v7, %v3128_v18 }
 0x3d3   :  { %v1962_v60 = vadd.f32 %v2363_v30, %v3128_v18 }
 0x3d5   :  { %v2292_v52 = vpack.c.bf16 %v1962_v60, %v1959_v31  ;;  %v2364_v9 = vpop.f32.mrb[92].mxu1 }
 0x3d6   :  { %v2365_v32 = vpop.f32.mrb[93].mxu1 }
 0x3d7   :  { %2304 = vst [vmem:[#allocation10 + $0x30] sm:$0xff] %v2292_v52   ;;  %v2366_v33 = vadd.f32 %v2365_v32, %v2364_v9  ;;  %v2367_v34 = vpop.f32.mrb[94].mxu1 }
 0x3d8   :  { %v2368_v10 = vpop.f32.mrb[95].mxu1 }
 0x3d9   :  { %v2369_v61 = vadd.f32 %v2368_v10, %v2367_v34  ;;  %v1967_v62 = vadd.f32 %v2366_v33, %v3128_v18 }
 0x3db   :  { %v1970_v53 = vadd.f32 %v2369_v61, %v3128_v18 }
 0x3dd   :  { %v2297_v35 = vpack.c.bf16 %v1970_v53, %v1967_v62 }
 0x3df   :  { %2305 = vst [vmem:[#allocation10 + $0x38] sm:$0xff] %v2297_v35  }
 0x3e0   :  { %2057 = vsyncadd [#allocation4], 960  ;;  %s2850_s6 = smov [#allocation10]  }
 0x3e1   :  { %s2058_s9 = sshll.u32 %s2850_s6, 4  ;;  %s2059_s9 = int_to_ptr.vmem [resolvable:$true] %s2058_s9 }
 0x3e2   :  { %s2809_s10 = scalar_lea.vmem %s2059_s9, 64  ;;  %s2813_s13 = scalar_lea.vmem %s2059_s9, 1024 }
 0x3e3   :  { %p2810_p4 = scmp.ne.s32.totalorder %s2059_s9, %s2809_s10  ;;  %p2814_p5 = scmp.lt.s32.totalorder %s2059_s9, %s2059_s9 }
 0x3e4   :  { %p2815_p6 = scmp.lt.s32.totalorder %s2813_s13, %s2809_s10 }
 0x3e6   :  { %p2816_p7 = por %p2815_p6, %p2814_p5 }
 0x3e8   :  { %p2817_p8 = pnand %p2816_p7, %p2810_p4 }
 0x3ea   :  { %2820 = shalt.err (!%p2817_p8)
}
 0x3eb   :  { %s2821_s17 = scalar_lea.hbm %s3168_s7, 64 }
 0x3ec   :  { %p2822_p9 = scmp.ne.s32.totalorder %s3168_s7, %s2821_s17  ;;  %p2825_p10 = scmp.lt.u32.totalorder %s2821_s17, %s3168_s7 }
 0x3ee   :  { %p2827_p11 = pnand %p2825_p10, %p2822_p9 }
 0x3f0   :  { %2830 = shalt.err (!%p2827_p11)
}
 0x3f1   :  { %2064 = dma.vmem_to_hbm [thread:$0]  %s2059_s9, 64, %s3168_s7, [#allocation4], %s2847_s3, %s2847_s3, %s2848_s11  }
 0x3f2   :  { %2837 = dma.done.wait [#allocation4], 1024  }
 0x3f3   :  { %2838 = vsyncadd [#allocation4], 4294966272 }
 0x3f4   :  { %2068 = vsyncpa [#allocation3], 1 }
 0x3f5   :  { %2069 = vsyncpa [#allocation6], 1 }
 0x3f6   :  { %2070 = vsyncpa [#allocation9], 1 }
 0x3f7   :  { %2071 = vsyncpa [#allocation4], 1 }

</bundles_post_ra>
